<compile_context>
chip_gen: v7x
topology: tpu7x:2x2x1
jax: 0.10.0
libtpu: 0.0.40
codegen_flags: <defaults>
</compile_context>

<pallas_src>
import functools

import jax
import jax.numpy as jnp
from jax.experimental import pallas as pl
from jax.experimental.pallas import tpu as pltpu


# ----------------------------------------------------------------------------
# Fused Pallas kernel: one grid step == block_b images, everything in VMEM.
# ----------------------------------------------------------------------------
def _oa_kernel(x_ref, mask_ref, wh_ref, bh_ref, wv_ref, bv_ref,
               ew_ref, wc_ref, bc_ref, o_ref, *, C, H, W, block_b):
    HW = H * W
    N = block_b * HW

    # Fold the batch block into the lane axis: one (C, N) f32 activation slab.
    if block_b == 1:
        x = x_ref[0]
    else:
        x = jnp.concatenate([x_ref[b] for b in range(block_b)], axis=1)

    m_up = mask_ref[0:1, :]      # 1.0 where h != 0      (row h-1 tap valid)
    m_dn = mask_ref[1:2, :]      # 1.0 where h != H-1    (row h+1 tap valid)
    m_lt = mask_ref[2:3, :]      # 1.0 where w != 0      (col w-1 tap valid)
    m_rt = mask_ref[3:4, :]      # 1.0 where w != W-1    (col w+1 tap valid)

    def conv_bn_relu(inp, layer, w_ref, b_ref, shift, m_lo, m_hi):
        # inp: (C, N) f32.  w_ref[layer]: (Cout, 3*Cin) bf16 with BN folded and
        # the taps packed as [w_{-1} | w_0 | w_{+1}] along the contraction axis.
        # Rolls land on the XLU; mask multiplies / bias / ReLU stay f32 (VPU).
        prev = pltpu.roll(inp, shift, axis=1) * m_lo        # "-1" neighbour tap
        nxt = pltpu.roll(inp, N - shift, axis=1) * m_hi     # "+1" neighbour tap
        taps = jnp.concatenate([prev, inp, nxt], axis=0)    # (3C, N) f32
        y = jnp.dot(w_ref[layer], taps.astype(jnp.bfloat16),
                    preferred_element_type=jnp.float32)     # one MXU dot / layer
        return jnp.maximum(y + b_ref[layer], 0.0)

    h = x
    v = x
    for i in range(3):
        h = conv_bn_relu(h, i, wh_ref, bh_ref, W, m_up, m_dn)   # (3,1) conv path
        v = conv_bn_relu(v, i, wv_ref, bv_ref, 1, m_lt, m_rt)   # (1,3) conv path
    h_edge = x + h
    v_edge = x + v

    # Per-image epilogue: ECA channel attention + 1x1 combine(+BN) + gating.
    inv_hw = 1.0 / HW
    z1 = jnp.zeros((1, 1), jnp.float32)
    for b in range(block_b):                       # static; lane-aligned slices
        lo, hi = b * HW, (b + 1) * HW
        he = h_edge[:, lo:hi]
        ve = v_edge[:, lo:hi]
        xb = x[:, lo:hi]

        # ECA: per-channel spatial mean of cat([h_edge, v_edge]) -> conv1d(k=3)
        # over channels -> sigmoid.
        m = jnp.concatenate([jnp.sum(he, axis=1, keepdims=True),
                             jnp.sum(ve, axis=1, keepdims=True)],
                            axis=0) * inv_hw                          # (2C, 1)
        mp = jnp.concatenate([z1, m, z1], axis=0)                     # (2C+2, 1)
        z = (mp[0:2 * C, :] * ew_ref[0:1, :]
             + mp[1:2 * C + 1, :] * ew_ref[1:2, :]
             + mp[2:2 * C + 2, :] * ew_ref[2:3, :])                   # (2C, 1)
        s = jax.nn.sigmoid(z)                                         # ECA scales

        # 1x1 combine conv (+ folded bn_combine): fold the ECA scale into the
        # weights so the scaled concat is never materialised.  Kept as an f32
        # VPU reduce; for large C switch this to two (1,C)@(C,HW) MXU matvecs.
        wc = wc_ref[...] * s                                          # (2C, 1)
        comb = jnp.sum(he * wc[0:C, :] + ve * wc[C:2 * C, :],
                       axis=0, keepdims=True) + bc_ref[...]           # (1, HW)
        comb = jax.nn.sigmoid(comb)

        o_ref[b] = (xb * comb).astype(o_ref.dtype)


def orthogonal_attention_forward(params, x_nchw, *, num_steps=1):
    """Fused OrthogonalAttention forward.

    num_steps: grid size (must divide batch).  1 (default) folds the whole
    batch into a single step — best on single-TensorCore v5e/v6e and widest
    matmul N.  Use 2 on v7x so the "parallel" grid axis maps one half of the
    batch to each TensorCore.
    """
    B, C, H, W = x_nchw.shape
    HW = H * W
    assert B % num_steps == 0, "num_steps must divide batch"
    block_b = B // num_steps
    N = block_b * HW

    x2 = x_nchw.reshape(B, C, HW).astype(jnp.float32)   # free reshape

    # 0/1 boundary-validity masks for the rolled conv taps (constant-folded by
    # XLA under jit).  Periodic in HW, so one (4, N) table serves every step
    # and every image, including the roll wrap-around at image boundaries.
    pos = jnp.arange(N, dtype=jnp.int32) % HW
    h_idx = pos // W
    w_idx = pos % W
    masks = jnp.stack([(h_idx != 0), (h_idx != H - 1),
                       (w_idx != 0), (w_idx != W - 1)]).astype(jnp.float32)

    kernel = functools.partial(_oa_kernel, C=C, H=H, W=W, block_b=block_b)
    out = pl.pallas_call(
        kernel,
        out_shape=jax.ShapeDtypeStruct((B, C, HW), jnp.float32),
        grid=(num_steps,),
        in_specs=[
            pl.BlockSpec((block_b, C, HW), lambda g: (g, 0, 0)),   # x
            pl.BlockSpec((4, N), lambda g: (0, 0)),                # boundary masks
            pl.BlockSpec((3, C, 3 * C), lambda g: (0, 0, 0)),      # w_h (bf16, K-packed)
            pl.BlockSpec((3, C, 1), lambda g: (0, 0, 0)),          # b_h
            pl.BlockSpec((3, C, 3 * C), lambda g: (0, 0, 0)),      # w_v
            pl.BlockSpec((3, C, 1), lambda g: (0, 0, 0)),          # b_v
            pl.BlockSpec((3, 1), lambda g: (0, 0)),                # eca conv1d weights
            pl.BlockSpec((2 * C, 1), lambda g: (0, 0)),            # combine weights
            pl.BlockSpec((1, 1), lambda g: (0, 0)),                # combine bias
        ],
        out_specs=pl.BlockSpec((block_b, C, HW), lambda g: (g, 0, 0)),
        compiler_params=pltpu.CompilerParams(dimension_semantics=("parallel",)),
        # NOTE: at much larger C*H*W (esp. v7x's 64 MiB VMEM) add an H-tile grid
        # axis with a 1-row halo and set vmem_limit_bytes; moot at this size.
    )(x2, masks, params["w_h"], params["b_h"], params["w_v"], params["b_v"],
      params["eca_w"], params["w_comb"], params["b_comb"])
    return out.reshape(B, C, H, W)


# ----------------------------------------------------------------------------
# Parameter construction (synthetic, PyTorch layouts) and BN/bias folding.
# ----------------------------------------------------------------------------
def init_raw_params(key, C):
    keys = iter(jax.random.split(key, 64))

    def conv_p(cin, cout, kh, kw):
        w = jax.random.normal(next(keys), (cout, cin, kh, kw), jnp.float32) * 0.1
        b = jax.random.normal(next(keys), (cout,), jnp.float32) * 0.1
        return w, b

    def bn_p(c):
        gamma = 1.0 + 0.1 * jax.random.normal(next(keys), (c,), jnp.float32)
        beta = 0.1 * jax.random.normal(next(keys), (c,), jnp.float32)
        mean = 0.1 * jax.random.normal(next(keys), (c,), jnp.float32)
        var = 1.0 + 0.1 * jax.random.uniform(next(keys), (c,), jnp.float32)
        return (gamma, beta, mean, var, 1e-5)

    raw = {}
    for i in range(3):
        raw[f"conv_h_{i}"] = conv_p(C, C, 3, 1)
        raw[f"bn_h_{i}"] = bn_p(C)
        raw[f"conv_v_{i}"] = conv_p(C, C, 1, 3)
        raw[f"bn_v_{i}"] = bn_p(C)
    raw["conv_combine"] = conv_p(2 * C, 1, 1, 1)
    raw["bn_combine"] = bn_p(1)
    raw["eca_w"] = jax.random.normal(next(keys), (1, 1, 3), jnp.float32) * 0.3
    return raw


def fold_params(raw, C):
    """Fold conv bias + eval-mode BN into weights/bias; pack taps along K."""
    def fold(wb, bnp, orient):
        w, b = wb
        gamma, beta, mean, var, eps = bnp
        scale = gamma / jnp.sqrt(var + eps)
        shift = beta - mean * scale
        wf = w * scale[:, None, None, None]
        bf = b * scale + shift
        taps = wf[:, :, :, 0] if orient == "h" else wf[:, :, 0, :]    # (Cout,Cin,3)
        # Pack the 3 taps along the contraction axis in [-1 | 0 | +1] order,
        # matching the kernel's stacked-tap (3C, N) activation slab.
        packed = jnp.concatenate([taps[:, :, 0], taps[:, :, 1], taps[:, :, 2]],
                                 axis=1)                              # (Cout, 3*Cin)
        return packed, bf.reshape(C, 1)

    wh, bh = zip(*[fold(raw[f"conv_h_{i}"], raw[f"bn_h_{i}"], "h") for i in range(3)])
    wv, bv = zip(*[fold(raw[f"conv_v_{i}"], raw[f"bn_v_{i}"], "v") for i in range(3)])

    wc, bc = raw["conv_combine"]
    gamma, beta, mean, var, eps = raw["bn_combine"]
    scale_c = gamma / jnp.sqrt(var + eps)
    shift_c = beta - mean * scale_c

    return {
        "w_h": jnp.stack(wh).astype(jnp.bfloat16),          # (3 layers, C, 3C)
        "b_h": jnp.stack(bh),                               # (3, C, 1)
        "w_v": jnp.stack(wv).astype(jnp.bfloat16),
        "b_v": jnp.stack(bv),
        "eca_w": raw["eca_w"][0, 0, :].reshape(3, 1),
        "w_comb": (wc[0, :, 0, 0] * scale_c[0]).reshape(2 * C, 1),
        "b_comb": (bc * scale_c + shift_c).reshape(1, 1),
    }


# ----------------------------------------------------------------------------
# Pure-JAX f32 reference (matches the PyTorch forward, eval mode).
# ----------------------------------------------------------------------------
def reference_forward(raw, x):
    def bn(y, p):
        gamma, beta, mean, var, eps = p
        inv = gamma / jnp.sqrt(var + eps)
        return (y - mean[None, :, None, None]) * inv[None, :, None, None] \
            + beta[None, :, None, None]

    def conv(y, w, b, pad):
        out = jax.lax.conv_general_dilated(
            y, w, window_strides=(1, 1),
            padding=((pad[0], pad[0]), (pad[1], pad[1])),
            dimension_numbers=("NCHW", "OIHW", "NCHW"))
        return out + b[None, :, None, None]

    h, v = x, x
    for i in range(3):
        wh, bh = raw[f"conv_h_{i}"]
        h = jax.nn.relu(bn(conv(h, wh, bh, (1, 0)), raw[f"bn_h_{i}"]))
        wv, bv = raw[f"conv_v_{i}"]
        v = jax.nn.relu(bn(conv(v, wv, bv, (0, 1)), raw[f"bn_v_{i}"]))
    h_edge = x + h
    v_edge = x + v

    cat = jnp.concatenate([h_edge, v_edge], axis=1)
    y = jnp.mean(cat, axis=(2, 3))                            # (B, 2C)
    k = raw["eca_w"]
    yp = jnp.pad(y, ((0, 0), (1, 1)))
    z = k[0, 0, 0] * yp[:, :-2] + k[0, 0, 1] * yp[:, 1:-1] + k[0, 0, 2] * yp[:, 2:]
    s = jax.nn.sigmoid(z)
    scaled = cat * s[:, :, None, None]

    wc, bc = raw["conv_combine"]
    comb = jnp.einsum("bchw,c->bhw", scaled, wc[0, :, 0, 0])[:, None] \
        + bc[None, :, None, None]
    comb = jax.nn.sigmoid(bn(comb, raw["bn_combine"]))
    return x * comb


# ----------------------------------------------------------------------------
if __name__ == "__main__":
    B, C, H, W = 2, 4, 16, 16        # in_channels == out_channels (module requires it)
    key = jax.random.PRNGKey(0)
    pkey, xkey = jax.random.split(key)
    raw = init_raw_params(pkey, C)
    params = fold_params(raw, C)
    x = jax.random.normal(xkey, (B, C, H, W), jnp.float32)

    fwd = jax.jit(orthogonal_attention_forward, static_argnames=("num_steps",))
    out = jax.block_until_ready(fwd(params, x))   # default: whole batch in 1 step

    assert out.shape == (B, C, H, W), out.shape
    assert bool(jnp.all(jnp.isfinite(out)))

    ref = jax.block_until_ready(reference_forward(raw, x))
    err = float(jnp.max(jnp.abs(out - ref)))
    assert err < 2e-2, f"max |pallas - reference| = {err}"   # bf16 MXU drift budget
    print("KERNEL_OK")
</pallas_src>

<mosaic_0001>
module attributes {stable_mosaic.version = 11 : i64} {
  func.func @_oa_kernel(%arg0: i32, %arg1: memref<2x4x256xf32, #tpu.memory_space<vmem>>, %arg2: memref<4x512xf32, #tpu.memory_space<vmem>>, %arg3: memref<3x4x12xbf16, #tpu.memory_space<vmem>>, %arg4: memref<3x4x1xf32, #tpu.memory_space<vmem>>, %arg5: memref<3x4x12xbf16, #tpu.memory_space<vmem>>, %arg6: memref<3x4x1xf32, #tpu.memory_space<vmem>>, %arg7: memref<3x1xf32, #tpu.memory_space<vmem>>, %arg8: memref<8x1xf32, #tpu.memory_space<vmem>>, %arg9: memref<1x1xf32, #tpu.memory_space<vmem>>, %arg10: memref<2x4x256xf32, #tpu.memory_space<vmem>>) attributes {dimension_semantics = [#tpu.dimension_semantics<parallel>], iteration_bounds = array<i64: 1>, scalar_prefetch = 0 : i64, scratch_operands = 0 : i64, tpu.core_type = #tpu.core_type<tc>, window_params = [{transform_indices = @transform_0, window_bounds = array<i64: 2, 4, 256>}, {pipeline_mode = #tpu.pipeline_mode<synchronous>, transform_indices = @transform_1, window_bounds = array<i64: 4, 512>}, {pipeline_mode = #tpu.pipeline_mode<synchronous>, transform_indices = @transform_2, window_bounds = array<i64: 3, 4, 12>}, {pipeline_mode = #tpu.pipeline_mode<synchronous>, transform_indices = @transform_3, window_bounds = array<i64: 3, 4, 1>}, {pipeline_mode = #tpu.pipeline_mode<synchronous>, transform_indices = @transform_4, window_bounds = array<i64: 3, 4, 12>}, {pipeline_mode = #tpu.pipeline_mode<synchronous>, transform_indices = @transform_5, window_bounds = array<i64: 3, 4, 1>}, {pipeline_mode = #tpu.pipeline_mode<synchronous>, transform_indices = @transform_6, window_bounds = array<i64: 3, 1>}, {pipeline_mode = #tpu.pipeline_mode<synchronous>, transform_indices = @transform_7, window_bounds = array<i64: 8, 1>}, {pipeline_mode = #tpu.pipeline_mode<synchronous>, transform_indices = @transform_8, window_bounds = array<i64: 1, 1>}, {transform_indices = @transform_9, window_bounds = array<i64: 2, 4, 256>}]} {
    %c0 = arith.constant 0 : index
    %c0_0 = arith.constant 0 : index
    %c0_1 = arith.constant 0 : index
    %0 = vector.load %arg1[%c0, %c0_0, %c0_1] : memref<2x4x256xf32, #tpu.memory_space<vmem>>, vector<1x4x256xf32>
    %1 = vector.shape_cast %0 : vector<1x4x256xf32> to vector<4x256xf32>
    %c1 = arith.constant 1 : index
    %c0_2 = arith.constant 0 : index
    %c0_3 = arith.constant 0 : index
    %2 = vector.load %arg1[%c1, %c0_2, %c0_3] : memref<2x4x256xf32, #tpu.memory_space<vmem>>, vector<1x4x256xf32>
    %3 = vector.shape_cast %2 : vector<1x4x256xf32> to vector<4x256xf32>
    %4 = tpu.concatenate %1, %3 in 1 : vector<4x256xf32>, vector<4x256xf32> -> vector<4x512xf32>
    %c0_4 = arith.constant 0 : index
    %c0_5 = arith.constant 0 : index
    %5 = vector.load %arg2[%c0_4, %c0_5] : memref<4x512xf32, #tpu.memory_space<vmem>>, vector<1x512xf32>
    %c1_6 = arith.constant 1 : index
    %c0_7 = arith.constant 0 : index
    %6 = vector.load %arg2[%c1_6, %c0_7] : memref<4x512xf32, #tpu.memory_space<vmem>>, vector<1x512xf32>
    %c2 = arith.constant 2 : index
    %c0_8 = arith.constant 0 : index
    %7 = vector.load %arg2[%c2, %c0_8] : memref<4x512xf32, #tpu.memory_space<vmem>>, vector<1x512xf32>
    %c3 = arith.constant 3 : index
    %c0_9 = arith.constant 0 : index
    %8 = vector.load %arg2[%c3, %c0_9] : memref<4x512xf32, #tpu.memory_space<vmem>>, vector<1x512xf32>
    %c16_i32 = arith.constant 16 : i32
    %9 = tpu.dynamic_rotate %4 by %c16_i32 dim 1 : vector<4x512xf32>, i32 -> vector<4x512xf32>
    %10 = vector.broadcast %5 : vector<1x512xf32> to vector<4x512xf32>
    %11 = arith.mulf %9, %10 : vector<4x512xf32>
    %c496_i32 = arith.constant 496 : i32
    %12 = tpu.dynamic_rotate %4 by %c496_i32 dim 1 : vector<4x512xf32>, i32 -> vector<4x512xf32>
    %13 = vector.broadcast %6 : vector<1x512xf32> to vector<4x512xf32>
    %14 = arith.mulf %12, %13 : vector<4x512xf32>
    %15 = tpu.concatenate %11, %4, %14 in 0 : vector<4x512xf32>, vector<4x512xf32>, vector<4x512xf32> -> vector<12x512xf32>
    %c0_10 = arith.constant 0 : index
    %c0_11 = arith.constant 0 : index
    %c0_12 = arith.constant 0 : index
    %16 = vector.load %arg3[%c0_10, %c0_11, %c0_12] : memref<3x4x12xbf16, #tpu.memory_space<vmem>>, vector<1x4x12xbf16>
    %17 = vector.shape_cast %16 : vector<1x4x12xbf16> to vector<4x12xbf16>
    %18 = arith.truncf %15 : vector<12x512xf32> to vector<12x512xbf16>
    %cst = arith.constant dense<0.000000e+00> : vector<4x512xf32>
    %19 = tpu.matmul %17, %18, %cst {dimension_numbers = #tpu.dot_dimension_numbers<[1], [0], [0], [1], [0, 0, 1, 1], [], []>} : vector<4x12xbf16>, vector<12x512xbf16>, vector<4x512xf32> -> vector<4x512xf32>
    %c0_13 = arith.constant 0 : index
    %c0_14 = arith.constant 0 : index
    %c0_15 = arith.constant 0 : index
    %20 = vector.load %arg4[%c0_13, %c0_14, %c0_15] : memref<3x4x1xf32, #tpu.memory_space<vmem>>, vector<1x4x1xf32>
    %21 = vector.shape_cast %20 : vector<1x4x1xf32> to vector<4x1xf32>
    %22 = vector.broadcast %21 : vector<4x1xf32> to vector<4x512xf32>
    %23 = arith.addf %19, %22 : vector<4x512xf32>
    %cst_16 = arith.constant 0.000000e+00 : f32
    %24 = vector.broadcast %cst_16 : f32 to vector<4x512xf32>
    %25 = arith.maximumf %23, %24 : vector<4x512xf32>
    %c1_i32 = arith.constant 1 : i32
    %26 = tpu.dynamic_rotate %4 by %c1_i32 dim 1 : vector<4x512xf32>, i32 -> vector<4x512xf32>
    %27 = vector.broadcast %7 : vector<1x512xf32> to vector<4x512xf32>
    %28 = arith.mulf %26, %27 : vector<4x512xf32>
    %c511_i32 = arith.constant 511 : i32
    %29 = tpu.dynamic_rotate %4 by %c511_i32 dim 1 : vector<4x512xf32>, i32 -> vector<4x512xf32>
    %30 = vector.broadcast %8 : vector<1x512xf32> to vector<4x512xf32>
    %31 = arith.mulf %29, %30 : vector<4x512xf32>
    %32 = tpu.concatenate %28, %4, %31 in 0 : vector<4x512xf32>, vector<4x512xf32>, vector<4x512xf32> -> vector<12x512xf32>
    %c0_17 = arith.constant 0 : index
    %c0_18 = arith.constant 0 : index
    %c0_19 = arith.constant 0 : index
    %33 = vector.load %arg5[%c0_17, %c0_18, %c0_19] : memref<3x4x12xbf16, #tpu.memory_space<vmem>>, vector<1x4x12xbf16>
    %34 = vector.shape_cast %33 : vector<1x4x12xbf16> to vector<4x12xbf16>
    %35 = arith.truncf %32 : vector<12x512xf32> to vector<12x512xbf16>
    %cst_20 = arith.constant dense<0.000000e+00> : vector<4x512xf32>
    %36 = tpu.matmul %34, %35, %cst_20 {dimension_numbers = #tpu.dot_dimension_numbers<[1], [0], [0], [1], [0, 0, 1, 1], [], []>} : vector<4x12xbf16>, vector<12x512xbf16>, vector<4x512xf32> -> vector<4x512xf32>
    %c0_21 = arith.constant 0 : index
    %c0_22 = arith.constant 0 : index
    %c0_23 = arith.constant 0 : index
    %37 = vector.load %arg6[%c0_21, %c0_22, %c0_23] : memref<3x4x1xf32, #tpu.memory_space<vmem>>, vector<1x4x1xf32>
    %38 = vector.shape_cast %37 : vector<1x4x1xf32> to vector<4x1xf32>
    %39 = vector.broadcast %38 : vector<4x1xf32> to vector<4x512xf32>
    %40 = arith.addf %36, %39 : vector<4x512xf32>
    %cst_24 = arith.constant 0.000000e+00 : f32
    %41 = vector.broadcast %cst_24 : f32 to vector<4x512xf32>
    %42 = arith.maximumf %40, %41 : vector<4x512xf32>
    %c16_i32_25 = arith.constant 16 : i32
    %43 = tpu.dynamic_rotate %25 by %c16_i32_25 dim 1 : vector<4x512xf32>, i32 -> vector<4x512xf32>
    %44 = vector.broadcast %5 : vector<1x512xf32> to vector<4x512xf32>
    %45 = arith.mulf %43, %44 : vector<4x512xf32>
    %c496_i32_26 = arith.constant 496 : i32
    %46 = tpu.dynamic_rotate %25 by %c496_i32_26 dim 1 : vector<4x512xf32>, i32 -> vector<4x512xf32>
    %47 = vector.broadcast %6 : vector<1x512xf32> to vector<4x512xf32>
    %48 = arith.mulf %46, %47 : vector<4x512xf32>
    %49 = tpu.concatenate %45, %25, %48 in 0 : vector<4x512xf32>, vector<4x512xf32>, vector<4x512xf32> -> vector<12x512xf32>
    %c1_27 = arith.constant 1 : index
    %c0_28 = arith.constant 0 : index
    %c0_29 = arith.constant 0 : index
    %50 = vector.load %arg3[%c1_27, %c0_28, %c0_29] : memref<3x4x12xbf16, #tpu.memory_space<vmem>>, vector<1x4x12xbf16>
    %51 = vector.shape_cast %50 : vector<1x4x12xbf16> to vector<4x12xbf16>
    %52 = arith.truncf %49 : vector<12x512xf32> to vector<12x512xbf16>
    %cst_30 = arith.constant dense<0.000000e+00> : vector<4x512xf32>
    %53 = tpu.matmul %51, %52, %cst_30 {dimension_numbers = #tpu.dot_dimension_numbers<[1], [0], [0], [1], [0, 0, 1, 1], [], []>} : vector<4x12xbf16>, vector<12x512xbf16>, vector<4x512xf32> -> vector<4x512xf32>
    %c1_31 = arith.constant 1 : index
    %c0_32 = arith.constant 0 : index
    %c0_33 = arith.constant 0 : index
    %54 = vector.load %arg4[%c1_31, %c0_32, %c0_33] : memref<3x4x1xf32, #tpu.memory_space<vmem>>, vector<1x4x1xf32>
    %55 = vector.shape_cast %54 : vector<1x4x1xf32> to vector<4x1xf32>
    %56 = vector.broadcast %55 : vector<4x1xf32> to vector<4x512xf32>
    %57 = arith.addf %53, %56 : vector<4x512xf32>
    %cst_34 = arith.constant 0.000000e+00 : f32
    %58 = vector.broadcast %cst_34 : f32 to vector<4x512xf32>
    %59 = arith.maximumf %57, %58 : vector<4x512xf32>
    %c1_i32_35 = arith.constant 1 : i32
    %60 = tpu.dynamic_rotate %42 by %c1_i32_35 dim 1 : vector<4x512xf32>, i32 -> vector<4x512xf32>
    %61 = vector.broadcast %7 : vector<1x512xf32> to vector<4x512xf32>
    %62 = arith.mulf %60, %61 : vector<4x512xf32>
    %c511_i32_36 = arith.constant 511 : i32
    %63 = tpu.dynamic_rotate %42 by %c511_i32_36 dim 1 : vector<4x512xf32>, i32 -> vector<4x512xf32>
    %64 = vector.broadcast %8 : vector<1x512xf32> to vector<4x512xf32>
    %65 = arith.mulf %63, %64 : vector<4x512xf32>
    %66 = tpu.concatenate %62, %42, %65 in 0 : vector<4x512xf32>, vector<4x512xf32>, vector<4x512xf32> -> vector<12x512xf32>
    %c1_37 = arith.constant 1 : index
    %c0_38 = arith.constant 0 : index
    %c0_39 = arith.constant 0 : index
    %67 = vector.load %arg5[%c1_37, %c0_38, %c0_39] : memref<3x4x12xbf16, #tpu.memory_space<vmem>>, vector<1x4x12xbf16>
    %68 = vector.shape_cast %67 : vector<1x4x12xbf16> to vector<4x12xbf16>
    %69 = arith.truncf %66 : vector<12x512xf32> to vector<12x512xbf16>
    %cst_40 = arith.constant dense<0.000000e+00> : vector<4x512xf32>
    %70 = tpu.matmul %68, %69, %cst_40 {dimension_numbers = #tpu.dot_dimension_numbers<[1], [0], [0], [1], [0, 0, 1, 1], [], []>} : vector<4x12xbf16>, vector<12x512xbf16>, vector<4x512xf32> -> vector<4x512xf32>
    %c1_41 = arith.constant 1 : index
    %c0_42 = arith.constant 0 : index
    %c0_43 = arith.constant 0 : index
    %71 = vector.load %arg6[%c1_41, %c0_42, %c0_43] : memref<3x4x1xf32, #tpu.memory_space<vmem>>, vector<1x4x1xf32>
    %72 = vector.shape_cast %71 : vector<1x4x1xf32> to vector<4x1xf32>
    %73 = vector.broadcast %72 : vector<4x1xf32> to vector<4x512xf32>
    %74 = arith.addf %70, %73 : vector<4x512xf32>
    %cst_44 = arith.constant 0.000000e+00 : f32
    %75 = vector.broadcast %cst_44 : f32 to vector<4x512xf32>
    %76 = arith.maximumf %74, %75 : vector<4x512xf32>
    %c16_i32_45 = arith.constant 16 : i32
    %77 = tpu.dynamic_rotate %59 by %c16_i32_45 dim 1 : vector<4x512xf32>, i32 -> vector<4x512xf32>
    %78 = vector.broadcast %5 : vector<1x512xf32> to vector<4x512xf32>
    %79 = arith.mulf %77, %78 : vector<4x512xf32>
    %c496_i32_46 = arith.constant 496 : i32
    %80 = tpu.dynamic_rotate %59 by %c496_i32_46 dim 1 : vector<4x512xf32>, i32 -> vector<4x512xf32>
    %81 = vector.broadcast %6 : vector<1x512xf32> to vector<4x512xf32>
    %82 = arith.mulf %80, %81 : vector<4x512xf32>
    %83 = tpu.concatenate %79, %59, %82 in 0 : vector<4x512xf32>, vector<4x512xf32>, vector<4x512xf32> -> vector<12x512xf32>
    %c2_47 = arith.constant 2 : index
    %c0_48 = arith.constant 0 : index
    %c0_49 = arith.constant 0 : index
    %84 = vector.load %arg3[%c2_47, %c0_48, %c0_49] : memref<3x4x12xbf16, #tpu.memory_space<vmem>>, vector<1x4x12xbf16>
    %85 = vector.shape_cast %84 : vector<1x4x12xbf16> to vector<4x12xbf16>
    %86 = arith.truncf %83 : vector<12x512xf32> to vector<12x512xbf16>
    %cst_50 = arith.constant dense<0.000000e+00> : vector<4x512xf32>
    %87 = tpu.matmul %85, %86, %cst_50 {dimension_numbers = #tpu.dot_dimension_numbers<[1], [0], [0], [1], [0, 0, 1, 1], [], []>} : vector<4x12xbf16>, vector<12x512xbf16>, vector<4x512xf32> -> vector<4x512xf32>
    %c2_51 = arith.constant 2 : index
    %c0_52 = arith.constant 0 : index
    %c0_53 = arith.constant 0 : index
    %88 = vector.load %arg4[%c2_51, %c0_52, %c0_53] : memref<3x4x1xf32, #tpu.memory_space<vmem>>, vector<1x4x1xf32>
    %89 = vector.shape_cast %88 : vector<1x4x1xf32> to vector<4x1xf32>
    %90 = vector.broadcast %89 : vector<4x1xf32> to vector<4x512xf32>
    %91 = arith.addf %87, %90 : vector<4x512xf32>
    %cst_54 = arith.constant 0.000000e+00 : f32
    %92 = vector.broadcast %cst_54 : f32 to vector<4x512xf32>
    %93 = arith.maximumf %91, %92 : vector<4x512xf32>
    %c1_i32_55 = arith.constant 1 : i32
    %94 = tpu.dynamic_rotate %76 by %c1_i32_55 dim 1 : vector<4x512xf32>, i32 -> vector<4x512xf32>
    %95 = vector.broadcast %7 : vector<1x512xf32> to vector<4x512xf32>
    %96 = arith.mulf %94, %95 : vector<4x512xf32>
    %c511_i32_56 = arith.constant 511 : i32
    %97 = tpu.dynamic_rotate %76 by %c511_i32_56 dim 1 : vector<4x512xf32>, i32 -> vector<4x512xf32>
    %98 = vector.broadcast %8 : vector<1x512xf32> to vector<4x512xf32>
    %99 = arith.mulf %97, %98 : vector<4x512xf32>
    %100 = tpu.concatenate %96, %76, %99 in 0 : vector<4x512xf32>, vector<4x512xf32>, vector<4x512xf32> -> vector<12x512xf32>
    %c2_57 = arith.constant 2 : index
    %c0_58 = arith.constant 0 : index
    %c0_59 = arith.constant 0 : index
    %101 = vector.load %arg5[%c2_57, %c0_58, %c0_59] : memref<3x4x12xbf16, #tpu.memory_space<vmem>>, vector<1x4x12xbf16>
    %102 = vector.shape_cast %101 : vector<1x4x12xbf16> to vector<4x12xbf16>
    %103 = arith.truncf %100 : vector<12x512xf32> to vector<12x512xbf16>
    %cst_60 = arith.constant dense<0.000000e+00> : vector<4x512xf32>
    %104 = tpu.matmul %102, %103, %cst_60 {dimension_numbers = #tpu.dot_dimension_numbers<[1], [0], [0], [1], [0, 0, 1, 1], [], []>} : vector<4x12xbf16>, vector<12x512xbf16>, vector<4x512xf32> -> vector<4x512xf32>
    %c2_61 = arith.constant 2 : index
    %c0_62 = arith.constant 0 : index
    %c0_63 = arith.constant 0 : index
    %105 = vector.load %arg6[%c2_61, %c0_62, %c0_63] : memref<3x4x1xf32, #tpu.memory_space<vmem>>, vector<1x4x1xf32>
    %106 = vector.shape_cast %105 : vector<1x4x1xf32> to vector<4x1xf32>
    %107 = vector.broadcast %106 : vector<4x1xf32> to vector<4x512xf32>
    %108 = arith.addf %104, %107 : vector<4x512xf32>
    %cst_64 = arith.constant 0.000000e+00 : f32
    %109 = vector.broadcast %cst_64 : f32 to vector<4x512xf32>
    %110 = arith.maximumf %108, %109 : vector<4x512xf32>
    %111 = arith.addf %4, %93 : vector<4x512xf32>
    %112 = arith.addf %4, %110 : vector<4x512xf32>
    %cst_65 = arith.constant 0.000000e+00 : f32
    %113 = vector.broadcast %cst_65 : f32 to vector<1x1xf32>
    %114 = vector.extract_strided_slice %111 {offsets = [0, 0], sizes = [4, 256], strides = [1, 1]} : vector<4x512xf32> to vector<4x256xf32>
    %115 = vector.extract_strided_slice %112 {offsets = [0, 0], sizes = [4, 256], strides = [1, 1]} : vector<4x512xf32> to vector<4x256xf32>
    %116 = vector.extract_strided_slice %4 {offsets = [0, 0], sizes = [4, 256], strides = [1, 1]} : vector<4x512xf32> to vector<4x256xf32>
    %cst_66 = arith.constant dense<0.000000e+00> : vector<4xf32>
    %117 = vector.multi_reduction <add>, %114, %cst_66 [1] : vector<4x256xf32> to vector<4xf32>
    %118 = vector.shape_cast %117 : vector<4xf32> to vector<4x1xf32>
    %cst_67 = arith.constant dense<0.000000e+00> : vector<4xf32>
    %119 = vector.multi_reduction <add>, %115, %cst_67 [1] : vector<4x256xf32> to vector<4xf32>
    %120 = vector.shape_cast %119 : vector<4xf32> to vector<4x1xf32>
    %121 = tpu.concatenate %118, %120 in 0 : vector<4x1xf32>, vector<4x1xf32> -> vector<8x1xf32>
    %cst_68 = arith.constant 3.906250e-03 : f32
    %122 = vector.broadcast %cst_68 : f32 to vector<8x1xf32>
    %123 = arith.mulf %121, %122 : vector<8x1xf32>
    %124 = tpu.concatenate %113, %123, %113 in 0 : vector<1x1xf32>, vector<8x1xf32>, vector<1x1xf32> -> vector<10x1xf32>
    %125 = vector.extract_strided_slice %124 {offsets = [0, 0], sizes = [8, 1], strides = [1, 1]} : vector<10x1xf32> to vector<8x1xf32>
    %c0_69 = arith.constant 0 : index
    %c0_70 = arith.constant 0 : index
    %126 = vector.load %arg7[%c0_69, %c0_70] : memref<3x1xf32, #tpu.memory_space<vmem>>, vector<1x1xf32>
    %127 = vector.broadcast %126 : vector<1x1xf32> to vector<8x1xf32>
    %128 = arith.mulf %125, %127 : vector<8x1xf32>
    %129 = vector.extract_strided_slice %124 {offsets = [1, 0], sizes = [8, 1], strides = [1, 1]} : vector<10x1xf32> to vector<8x1xf32>
    %c1_71 = arith.constant 1 : index
    %c0_72 = arith.constant 0 : index
    %130 = vector.load %arg7[%c1_71, %c0_72] : memref<3x1xf32, #tpu.memory_space<vmem>>, vector<1x1xf32>
    %131 = vector.broadcast %130 : vector<1x1xf32> to vector<8x1xf32>
    %132 = arith.mulf %129, %131 : vector<8x1xf32>
    %133 = arith.addf %128, %132 : vector<8x1xf32>
    %134 = vector.extract_strided_slice %124 {offsets = [2, 0], sizes = [8, 1], strides = [1, 1]} : vector<10x1xf32> to vector<8x1xf32>
    %c2_73 = arith.constant 2 : index
    %c0_74 = arith.constant 0 : index
    %135 = vector.load %arg7[%c2_73, %c0_74] : memref<3x1xf32, #tpu.memory_space<vmem>>, vector<1x1xf32>
    %136 = vector.broadcast %135 : vector<1x1xf32> to vector<8x1xf32>
    %137 = arith.mulf %134, %136 : vector<8x1xf32>
    %138 = arith.addf %133, %137 : vector<8x1xf32>
    %139 = arith.negf %138 : vector<8x1xf32>
    %140 = math.exp %139 : vector<8x1xf32>
    %cst_75 = arith.constant 1.000000e+00 : f32
    %141 = vector.broadcast %cst_75 : f32 to vector<8x1xf32>
    %142 = arith.addf %141, %140 : vector<8x1xf32>
    %143 = arith.divf %141, %142 : vector<8x1xf32>
    %c0_76 = arith.constant 0 : index
    %c0_77 = arith.constant 0 : index
    %144 = vector.load %arg8[%c0_76, %c0_77] : memref<8x1xf32, #tpu.memory_space<vmem>>, vector<8x1xf32>
    %145 = arith.mulf %144, %143 : vector<8x1xf32>
    %146 = vector.extract_strided_slice %145 {offsets = [0, 0], sizes = [4, 1], strides = [1, 1]} : vector<8x1xf32> to vector<4x1xf32>
    %147 = vector.broadcast %146 : vector<4x1xf32> to vector<4x256xf32>
    %148 = arith.mulf %114, %147 : vector<4x256xf32>
    %149 = vector.extract_strided_slice %145 {offsets = [4, 0], sizes = [4, 1], strides = [1, 1]} : vector<8x1xf32> to vector<4x1xf32>
    %150 = vector.broadcast %149 : vector<4x1xf32> to vector<4x256xf32>
    %151 = arith.mulf %115, %150 : vector<4x256xf32>
    %152 = arith.addf %148, %151 : vector<4x256xf32>
    %cst_78 = arith.constant dense<0.000000e+00> : vector<256xf32>
    %153 = vector.multi_reduction <add>, %152, %cst_78 [0] : vector<4x256xf32> to vector<256xf32>
    %154 = vector.shape_cast %153 : vector<256xf32> to vector<1x256xf32>
    %c0_79 = arith.constant 0 : index
    %c0_80 = arith.constant 0 : index
    %155 = vector.load %arg9[%c0_79, %c0_80] : memref<1x1xf32, #tpu.memory_space<vmem>>, vector<1x1xf32>
    %156 = vector.broadcast %155 : vector<1x1xf32> to vector<1x256xf32>
    %157 = arith.addf %154, %156 : vector<1x256xf32>
    %158 = arith.negf %157 : vector<1x256xf32>
    %159 = math.exp %158 : vector<1x256xf32>
    %cst_81 = arith.constant 1.000000e+00 : f32
    %160 = vector.broadcast %cst_81 : f32 to vector<1x256xf32>
    %161 = arith.addf %160, %159 : vector<1x256xf32>
    %162 = arith.divf %160, %161 : vector<1x256xf32>
    %163 = vector.broadcast %162 : vector<1x256xf32> to vector<4x256xf32>
    %164 = arith.mulf %116, %163 : vector<4x256xf32>
    %c0_82 = arith.constant 0 : index
    %c0_83 = arith.constant 0 : index
    %c0_84 = arith.constant 0 : index
    %165 = vector.load %arg10[%c0_82, %c0_83, %c0_84] : memref<2x4x256xf32, #tpu.memory_space<vmem>>, vector<1x4x256xf32>
    %166 = vector.shape_cast %165 : vector<1x4x256xf32> to vector<4x256xf32>
    %167 = vector.shape_cast %164 : vector<4x256xf32> to vector<1x4x256xf32>
    tpu.vector_store %arg10[%c0_82, %c0_83, %c0_84], %167 {strides = array<i32>} : memref<2x4x256xf32, #tpu.memory_space<vmem>>, vector<1x4x256xf32>,
    %168 = vector.extract_strided_slice %111 {offsets = [0, 256], sizes = [4, 256], strides = [1, 1]} : vector<4x512xf32> to vector<4x256xf32>
    %169 = vector.extract_strided_slice %112 {offsets = [0, 256], sizes = [4, 256], strides = [1, 1]} : vector<4x512xf32> to vector<4x256xf32>
    %170 = vector.extract_strided_slice %4 {offsets = [0, 256], sizes = [4, 256], strides = [1, 1]} : vector<4x512xf32> to vector<4x256xf32>
    %cst_85 = arith.constant dense<0.000000e+00> : vector<4xf32>
    %171 = vector.multi_reduction <add>, %168, %cst_85 [1] : vector<4x256xf32> to vector<4xf32>
    %172 = vector.shape_cast %171 : vector<4xf32> to vector<4x1xf32>
    %cst_86 = arith.constant dense<0.000000e+00> : vector<4xf32>
    %173 = vector.multi_reduction <add>, %169, %cst_86 [1] : vector<4x256xf32> to vector<4xf32>
    %174 = vector.shape_cast %173 : vector<4xf32> to vector<4x1xf32>
    %175 = tpu.concatenate %172, %174 in 0 : vector<4x1xf32>, vector<4x1xf32> -> vector<8x1xf32>
    %cst_87 = arith.constant 3.906250e-03 : f32
    %176 = vector.broadcast %cst_87 : f32 to vector<8x1xf32>
    %177 = arith.mulf %175, %176 : vector<8x1xf32>
    %178 = tpu.concatenate %113, %177, %113 in 0 : vector<1x1xf32>, vector<8x1xf32>, vector<1x1xf32> -> vector<10x1xf32>
    %179 = vector.extract_strided_slice %178 {offsets = [0, 0], sizes = [8, 1], strides = [1, 1]} : vector<10x1xf32> to vector<8x1xf32>
    %c0_88 = arith.constant 0 : index
    %c0_89 = arith.constant 0 : index
    %180 = vector.load %arg7[%c0_88, %c0_89] : memref<3x1xf32, #tpu.memory_space<vmem>>, vector<1x1xf32>
    %181 = vector.broadcast %180 : vector<1x1xf32> to vector<8x1xf32>
    %182 = arith.mulf %179, %181 : vector<8x1xf32>
    %183 = vector.extract_strided_slice %178 {offsets = [1, 0], sizes = [8, 1], strides = [1, 1]} : vector<10x1xf32> to vector<8x1xf32>
    %c1_90 = arith.constant 1 : index
    %c0_91 = arith.constant 0 : index
    %184 = vector.load %arg7[%c1_90, %c0_91] : memref<3x1xf32, #tpu.memory_space<vmem>>, vector<1x1xf32>
    %185 = vector.broadcast %184 : vector<1x1xf32> to vector<8x1xf32>
    %186 = arith.mulf %183, %185 : vector<8x1xf32>
    %187 = arith.addf %182, %186 : vector<8x1xf32>
    %188 = vector.extract_strided_slice %178 {offsets = [2, 0], sizes = [8, 1], strides = [1, 1]} : vector<10x1xf32> to vector<8x1xf32>
    %c2_92 = arith.constant 2 : index
    %c0_93 = arith.constant 0 : index
    %189 = vector.load %arg7[%c2_92, %c0_93] : memref<3x1xf32, #tpu.memory_space<vmem>>, vector<1x1xf32>
    %190 = vector.broadcast %189 : vector<1x1xf32> to vector<8x1xf32>
    %191 = arith.mulf %188, %190 : vector<8x1xf32>
    %192 = arith.addf %187, %191 : vector<8x1xf32>
    %193 = arith.negf %192 : vector<8x1xf32>
    %194 = math.exp %193 : vector<8x1xf32>
    %cst_94 = arith.constant 1.000000e+00 : f32
    %195 = vector.broadcast %cst_94 : f32 to vector<8x1xf32>
    %196 = arith.addf %195, %194 : vector<8x1xf32>
    %197 = arith.divf %195, %196 : vector<8x1xf32>
    %c0_95 = arith.constant 0 : index
    %c0_96 = arith.constant 0 : index
    %198 = vector.load %arg8[%c0_95, %c0_96] : memref<8x1xf32, #tpu.memory_space<vmem>>, vector<8x1xf32>
    %199 = arith.mulf %198, %197 : vector<8x1xf32>
    %200 = vector.extract_strided_slice %199 {offsets = [0, 0], sizes = [4, 1], strides = [1, 1]} : vector<8x1xf32> to vector<4x1xf32>
    %201 = vector.broadcast %200 : vector<4x1xf32> to vector<4x256xf32>
    %202 = arith.mulf %168, %201 : vector<4x256xf32>
    %203 = vector.extract_strided_slice %199 {offsets = [4, 0], sizes = [4, 1], strides = [1, 1]} : vector<8x1xf32> to vector<4x1xf32>
    %204 = vector.broadcast %203 : vector<4x1xf32> to vector<4x256xf32>
    %205 = arith.mulf %169, %204 : vector<4x256xf32>
    %206 = arith.addf %202, %205 : vector<4x256xf32>
    %cst_97 = arith.constant dense<0.000000e+00> : vector<256xf32>
    %207 = vector.multi_reduction <add>, %206, %cst_97 [0] : vector<4x256xf32> to vector<256xf32>
    %208 = vector.shape_cast %207 : vector<256xf32> to vector<1x256xf32>
    %c0_98 = arith.constant 0 : index
    %c0_99 = arith.constant 0 : index
    %209 = vector.load %arg9[%c0_98, %c0_99] : memref<1x1xf32, #tpu.memory_space<vmem>>, vector<1x1xf32>
    %210 = vector.broadcast %209 : vector<1x1xf32> to vector<1x256xf32>
    %211 = arith.addf %208, %210 : vector<1x256xf32>
    %212 = arith.negf %211 : vector<1x256xf32>
    %213 = math.exp %212 : vector<1x256xf32>
    %cst_100 = arith.constant 1.000000e+00 : f32
    %214 = vector.broadcast %cst_100 : f32 to vector<1x256xf32>
    %215 = arith.addf %214, %213 : vector<1x256xf32>
    %216 = arith.divf %214, %215 : vector<1x256xf32>
    %217 = vector.broadcast %216 : vector<1x256xf32> to vector<4x256xf32>
    %218 = arith.mulf %170, %217 : vector<4x256xf32>
    %c1_101 = arith.constant 1 : index
    %c0_102 = arith.constant 0 : index
    %c0_103 = arith.constant 0 : index
    %219 = vector.load %arg10[%c1_101, %c0_102, %c0_103] : memref<2x4x256xf32, #tpu.memory_space<vmem>>, vector<1x4x256xf32>
    %220 = vector.shape_cast %219 : vector<1x4x256xf32> to vector<4x256xf32>
    %221 = vector.shape_cast %218 : vector<4x256xf32> to vector<1x4x256xf32>
    tpu.vector_store %arg10[%c1_101, %c0_102, %c0_103], %221 {strides = array<i32>} : memref<2x4x256xf32, #tpu.memory_space<vmem>>, vector<1x4x256xf32>,
    return
  }
  func.func @transform_0(%arg0: i32) -> (i32, i32, i32) {
    %c0_i32 = arith.constant 0 : i32
    %c0_i32_0 = arith.constant 0 : i32
    %c0_i32_1 = arith.constant 0 : i32
    return %arg0, %c0_i32, %c0_i32_0 : i32, i32, i32
  }
  func.func @transform_1(%arg0: i32) -> (i32, i32) {
    %c0_i32 = arith.constant 0 : i32
    %c0_i32_0 = arith.constant 0 : i32
    %c0_i32_1 = arith.constant 0 : i32
    return %c0_i32, %c0_i32_0 : i32, i32
  }
  func.func @transform_2(%arg0: i32) -> (i32, i32, i32) {
    %c0_i32 = arith.constant 0 : i32
    %c0_i32_0 = arith.constant 0 : i32
    %c0_i32_1 = arith.constant 0 : i32
    %c0_i32_2 = arith.constant 0 : i32
    return %c0_i32, %c0_i32_0, %c0_i32_1 : i32, i32, i32
  }
  func.func @transform_3(%arg0: i32) -> (i32, i32, i32) {
    %c0_i32 = arith.constant 0 : i32
    %c0_i32_0 = arith.constant 0 : i32
    %c0_i32_1 = arith.constant 0 : i32
    %c0_i32_2 = arith.constant 0 : i32
    return %c0_i32, %c0_i32_0, %c0_i32_1 : i32, i32, i32
  }
  func.func @transform_4(%arg0: i32) -> (i32, i32, i32) {
    %c0_i32 = arith.constant 0 : i32
    %c0_i32_0 = arith.constant 0 : i32
    %c0_i32_1 = arith.constant 0 : i32
    %c0_i32_2 = arith.constant 0 : i32
    return %c0_i32, %c0_i32_0, %c0_i32_1 : i32, i32, i32
  }
  func.func @transform_5(%arg0: i32) -> (i32, i32, i32) {
    %c0_i32 = arith.constant 0 : i32
    %c0_i32_0 = arith.constant 0 : i32
    %c0_i32_1 = arith.constant 0 : i32
    %c0_i32_2 = arith.constant 0 : i32
    return %c0_i32, %c0_i32_0, %c0_i32_1 : i32, i32, i32
  }
  func.func @transform_6(%arg0: i32) -> (i32, i32) {
    %c0_i32 = arith.constant 0 : i32
    %c0_i32_0 = arith.constant 0 : i32
    %c0_i32_1 = arith.constant 0 : i32
    return %c0_i32, %c0_i32_0 : i32, i32
  }
  func.func @transform_7(%arg0: i32) -> (i32, i32) {
    %c0_i32 = arith.constant 0 : i32
    %c0_i32_0 = arith.constant 0 : i32
    %c0_i32_1 = arith.constant 0 : i32
    return %c0_i32, %c0_i32_0 : i32, i32
  }
  func.func @transform_8(%arg0: i32) -> (i32, i32) {
    %c0_i32 = arith.constant 0 : i32
    %c0_i32_0 = arith.constant 0 : i32
    %c0_i32_1 = arith.constant 0 : i32
    return %c0_i32, %c0_i32_0 : i32, i32
  }
  func.func @transform_9(%arg0: i32) -> (i32, i32, i32) {
    %c0_i32 = arith.constant 0 : i32
    %c0_i32_0 = arith.constant 0 : i32
    %c0_i32_1 = arith.constant 0 : i32
    return %arg0, %c0_i32, %c0_i32_0 : i32, i32, i32
  }
}

</mosaic_0001>

<bundles_post_ra>
// kernel: orthogonal_attention_forward.1
= control target key start
LH: loop header
LB: loop body
LE: loop exit
PB: predicated region body
PF: predicated region fallthrough
CT: control target
= control target key end

     0   :  { %s1435_s13 = smov 16   ;;  %s1436_s14 = smov 112   ;;  %v1437_v4 = vmov 0   ;;  %v59_v7 = vlaneseq  ;;  %vm137_vm2 = vcmask 1043456   ;;  %vm157_vm3 = vcmask 1045504   ;;  %s2083_s0 = inlined_call_operand.vmem [shape: f32[2,4,256], index: 0, kind: input, shape index: {}]   ;;  %s2084_s3 = inlined_call_operand.vmem [shape: f32[3,4,1], index: 3, kind: input, shape index: {}]   ;;  %s2085_s5 = inlined_call_operand.vmem [shape: f32[3,4,1], index: 5, kind: input, shape index: {}]   ;;  %s2086_s1 = inlined_call_operand.vmem [shape: f32[4,512], index: 1, kind: input, shape index: {}]   ;;  %s2087_s2 = inlined_call_operand.vmem [shape: bf16[3,4,12], index: 2, kind: input, shape index: {}]   ;;  %s2088_s4 = inlined_call_operand.vmem [shape: bf16[3,4,12], index: 4, kind: input, shape index: {}]   ;;  %s2089_s8 = inlined_call_operand.<no memory space> [shape: f32[1,1], index: 8, kind: input, shape index: {}]   ;;  %s2090_s6 = inlined_call_operand.vmem [shape: f32[3,1], index: 6, kind: input, shape index: {}]   ;;  %s2091_s7 = inlined_call_operand.vmem [shape: f32[8,1], index: 7, kind: input, shape index: {}]   ;;  %s2092_s9 = inlined_call_operand.vmem [shape: f32[2,4,256], index: 9, kind: output, shape index: {}]  }
   0x1   :  { %v1493_v0 = vld [vmem:[%s2083_s0 + $0x8] sm:$0xff]  ;;  %v1498_v1 = vld [vmem:[%s2083_s0] sm:$0xff]  ;;  %202 = vmatprep.mubr.bf16.mxu0 %v1437_v4  ;;  %243 = vmatprep.mubr.bf16.mxu1 %v1437_v4  ;;  %s1438_s15 = smov 1   ;;  %s1439_s16 = smov 127   ;;  %vm153_vm4 = vcmask 97280   ;;  %vm1122_vm7 = vcmask 1040384  }
   0x2   :  { %55 = vrot.lane.b32.xlu1 %v1493_v0, %s1435_s13  ;;  %51 = vrot.lane.b32.xlu0 %v1498_v1, %s1435_s13  ;;  %v1506_v2 = vcombine.high %v1493_v0, %v1493_v0  ;;  %v1510_v3 = vcombine.high %v1498_v1, %v1498_v1  ;;  %v147_v5 = vld [vmem:[%s2084_s3] sm:$0xf]  ;;  %v68_v8 = vshrl.u32 %v59_v7, 7  ;;  %v1550_v9 = vand.u32 127, %v59_v7 }
   0x3   :  { %1405 = vset.pattern.permute.xlu0 %v1437_v4  ;;  %1406 = vset.pattern.permute.xlu1 %v1437_v4  ;;  %v341_v6 = vld [vmem:[%s2085_s5] sm:$0xf]  ;;  %v129_v33 = vrot.slane %v1498_v1, 4  ;;  %v131_v41 = vrot.slane %v1493_v0, 4  ;;  %vm1140_vm8 = vcmask 1046528  }
   0x4   :  { %v1552_v12 = vsub.s32 0, %v68_v8  ;;  %v44_v13 = vld [vmem:[%s2086_s1] ss:$4 sm:$0xf]  ;;  %vm61_vm0 = vcmp.lt.s32.totalorder %v1550_v9, 16  ;;  %v1561_v15 = vsub.s32 3, %v68_v8 }
   0x5   :  { %v1352_v14 = vld [vmem:[%s2086_s1 + $0x1] ss:$4 sm:$0xf]  ;;  %v1563_v16 = vsub.s32 1, %v68_v8  ;;  %v1565_v17 = vsub.s32 2, %v68_v8  ;;  %vm99_vm1 = vcmp.lt.s32.totalorder %v1550_v9, 112 }
   0x6   :  { %57 = vrot.lane.b32.xlu1 %v1506_v2, %s1435_s13  ;;  %53 = vrot.lane.b32.xlu0 %v1510_v3, %s1435_s13  ;;  %v1568_v20 = vrot.slane %v44_v13, %v1552_v12  ;;  %v1574_v22 = vrot.slane %v1352_v14, %v1552_v12  ;;  %v1577_v23 = vrot.slane %v44_v13, %v1561_v15  ;;  %v142_v62 = vld [vmem:[%s2087_s2] sm:$0x3]  ;;  %v1354_v63 = vld [vmem:[%s2086_s1 + $0x3] ss:$4 sm:$0xf]  ;;  %vm264_vm5 = vcmp.lt.s32.totalorder %v1550_v9, 1 }
   0x7   :  { %v1580_v24 = vrot.slane %v44_v13, %v1563_v16  ;;  %v1583_v25 = vrot.slane %v44_v13, %v1565_v17  ;;  %v1597_v35 = vrot.slane %v1352_v14, %v1561_v15  ;;  %v1600_v36 = vrot.slane %v1352_v14, %v1563_v16 }
   0x8   :  { %v1603_v37 = vrot.slane %v1352_v14, %v1565_v17  ;;  %vm302_vm6 = vcmp.lt.s32.totalorder %v1550_v9, 127 }
   0xa   :  { %93 = vrot.lane.b32.xlu1 %v1510_v3, %s1436_s14  ;;  %91 = vrot.lane.b32.xlu0 %v1498_v1, %s1436_s14 }
   0xe   :  { %97 = vrot.lane.b32.xlu1 %v1506_v2, %s1436_s14  ;;  %95 = vrot.lane.b32.xlu0 %v1493_v0, %s1436_s14 }
  0x12   :  { %258 = vrot.lane.b32.xlu1 %v1510_v3, %s1438_s15  ;;  %256 = vrot.lane.b32.xlu0 %v1498_v1, %s1438_s15 }
  0x16   :  { %262 = vrot.lane.b32.xlu1 %v1506_v2, %s1438_s15  ;;  %260 = vrot.lane.b32.xlu0 %v1493_v0, %s1438_s15 }
  0x1a   :  { %296 = vrot.lane.b32.xlu1 %v1510_v3, %s1439_s16  ;;  %294 = vrot.lane.b32.xlu0 %v1498_v1, %s1439_s16 }
  0x1e   :  { %300 = vrot.lane.b32.xlu1 %v1506_v2, %s1439_s16  ;;  %298 = vrot.lane.b32.xlu0 %v1493_v0, %s1439_s16 }
  0x22   :  { %150 = vperm.xlu0 %1405, %v147_v5   ;;  %344 = vperm.xlu1 %1406, %v341_v6   ;;  %v1353_v5 = vld [vmem:[%s2086_s1 + $0x2] ss:$4 sm:$0xf] }
  0x23   :  { %v1643_v8 = vrot.slane %v1353_v5, %v1552_v12  ;;  %v1654_v13 = vrot.slane %v1353_v5, %v1563_v16  ;;  %v1657_v14 = vrot.slane %v1353_v5, %v1565_v17 }
  0x74   :  { %v56_v10 = vpop.permute.xlu1 %55  ;;  %v52_v11 = vpop.permute.xlu0 %51 }
  0x78   :  { %v58_v18 = vpop.permute.xlu1 %57  ;;  %v54_v19 = vpop.permute.xlu0 %53 }
  0x79   :  { %v65_v21 = vsel %vm61_vm0, %v58_v18, %v52_v11  ;;  %v62_v26 = vsel %vm61_vm0, %v56_v10, %v58_v18  ;;  %v63_v27 = vsel %vm61_vm0, %v54_v19, %v56_v10  ;;  %v64_v28 = vsel %vm61_vm0, %v52_v11, %v54_v19 }
  0x7a   :  { %v87_v31 = vmul.f32 %v1568_v20, %v65_v21  ;;  %v90_v38 = vmul.f32 %v1577_v23, %v62_v26  ;;  %v88_v39 = vmul.f32 %v1580_v24, %v64_v28  ;;  %v89_v40 = vmul.f32 %v1583_v25, %v63_v27 }
  0x7b   :  { %v1651_v11 = vrot.slane %v1354_v63, %v1552_v12  ;;  %v1660_v18 = vrot.slane %v1353_v5, %v1561_v15 }
  0x7c   :  { %v94_v29 = vpop.permute.xlu1 %93  ;;  %v92_v30 = vpop.permute.xlu0 %91  ;;  %v138_v47 = vsel %vm137_vm2, %v87_v31, %v129_v33  ;;  %v139_v52 = vsel %vm137_vm2, %v88_v39, %v1510_v3  ;;  %v141_v53 = vsel %vm137_vm2, %v90_v38, %v1506_v2  ;;  %v140_v54 = vsel %vm137_vm2, %v89_v40, %v131_v41 }
  0x7d   :  { %v102_v32 = vsel %vm99_vm1, %v92_v30, %v94_v29  ;;  %v1681_v38 = vrot.slane %v1354_v63, %v1565_v17 }
  0x7e   :  { %v125_v34 = vmul.f32 %v1574_v22, %v102_v32  ;;  %v1675_v32 = vrot.slane %v1354_v63, %v1561_v15 }
  0x80   :  { %v98_v42 = vpop.permute.xlu1 %97  ;;  %v96_v43 = vpop.permute.xlu0 %95  ;;  %v143_v51 = vpack.c.bf16 %v125_v34, %v138_v47  ;;  %v1678_v34 = vrot.slane %v1354_v63, %v1563_v16 }
  0x81   :  { %v103_v44 = vsel %vm99_vm1, %v98_v42, %v92_v30  ;;  %v100_v45 = vsel %vm99_vm1, %v96_v43, %v98_v42  ;;  %v101_v46 = vsel %vm99_vm1, %v94_v29, %v96_v43 }
  0x82   :  { %v128_v48 = vmul.f32 %v1597_v35, %v103_v44  ;;  %v126_v49 = vmul.f32 %v1600_v36, %v101_v46  ;;  %v127_v50 = vmul.f32 %v1603_v37, %v100_v45  ;;  %v159_v60 = vsel %vm157_vm3, %v143_v51, 0 }
  0x84   :  { %v259_v55 = vpop.permute.xlu1 %258  ;;  %v257_v56 = vpop.permute.xlu0 %256  ;;  %v144_v57 = vpack.c.bf16 %v126_v49, %v139_v52  ;;  %v146_v58 = vpack.c.bf16 %v128_v48, %v141_v53  ;;  %v145_v59 = vpack.c.bf16 %v127_v50, %v140_v54 }
  0x85   :  { %v267_v19 = vsel %vm264_vm5, %v257_v56, %v259_v55 }
  0x86   :  { %1355 = vmatprep.subr.msk.bf16.mxu0 %vm157_vm3, %v144_v57  ;;  %1357 = vmatprep.subr.msk.bf16.mxu1 %vm157_vm3, %v146_v58  ;;  %v165_v61 = vsel %vm157_vm3, %v145_v59, 0  ;;  %v291_v39 = vmul.f32 %v1654_v13, %v267_v19  ;;  %v336_v57 = vld [vmem:[%s2088_s4] sm:$0x3] }
  0x87   :  { %171 = vmatpush1.bf16.msra.mxu0 %v159_v60  ;;  %212 = vmatpush1.bf16.msra.mxu1 %v165_v61 }
  0x88   :  { %v263_v6 = vpop.permute.xlu1 %262  ;;  %v261_v7 = vpop.permute.xlu0 %260 }
  0x89   :  { %v268_v10 = vsel %vm264_vm5, %v263_v6, %v257_v56  ;;  %v265_v21 = vsel %vm264_vm5, %v261_v7, %v263_v6  ;;  %v266_v26 = vsel %vm264_vm5, %v259_v55, %v261_v7 }
  0x8a   :  { %1356 = vmatmul.mubr.msk.bf16.vlgmr.msra.gmra.mrb[0].mxu0 %vm153_vm4, %v142_v62  ;;  %1358 = vmatmul.mubr.msk.bf16.vlgmr.msra.gmra.mrb[0].mxu1 %vm153_vm4, %v142_v62  ;;  %v290_v29 = vmul.f32 %v1643_v8, %v268_v10  ;;  %v292_v40 = vmul.f32 %v1657_v14, %v266_v26  ;;  %v293_v42 = vmul.f32 %v1660_v18, %v265_v21 }
  0x8b   :  { %394 = vmatprep.mubr.bf16.mxu0 %v1437_v4  ;;  %435 = vmatprep.mubr.bf16.mxu1 %v1437_v4 }
  0x8c   :  { %v297_v27 = vpop.permute.xlu1 %296  ;;  %v295_v28 = vpop.permute.xlu0 %294  ;;  %v332_v45 = vsel %vm137_vm2, %v290_v29, %v129_v33  ;;  %v335_v50 = vsel %vm137_vm2, %v293_v42, %v1506_v2  ;;  %v333_v33 = vsel %vm137_vm2, %v291_v39, %v1510_v3  ;;  %v334_v51 = vsel %vm137_vm2, %v292_v40, %v131_v41 }
  0x8d   :  { %v305_v30 = vsel %vm302_vm6, %v295_v28, %v297_v27 }
  0x8e   :  { %v328_v31 = vmul.f32 %v1651_v11, %v305_v30 }
  0x90   :  { %v301_v43 = vpop.permute.xlu1 %300  ;;  %v299_v44 = vpop.permute.xlu0 %298  ;;  %v337_v46 = vpack.c.bf16 %v328_v31, %v332_v45 }
  0x91   :  { %v306_v15 = vsel %vm302_vm6, %v301_v43, %v295_v28  ;;  %v303_v16 = vsel %vm302_vm6, %v299_v44, %v301_v43  ;;  %v304_v17 = vsel %vm302_vm6, %v297_v27, %v299_v44 }
  0x92   :  { %v331_v47 = vmul.f32 %v1675_v32, %v306_v15  ;;  %v329_v48 = vmul.f32 %v1678_v34, %v304_v17  ;;  %v330_v49 = vmul.f32 %v1681_v38, %v303_v16  ;;  %v351_v55 = vsel %vm157_vm3, %v337_v46, 0 }
  0x94   :  { %v340_v52 = vpack.c.bf16 %v331_v47, %v335_v50  ;;  %v338_v53 = vpack.c.bf16 %v329_v48, %v333_v33  ;;  %v339_v54 = vpack.c.bf16 %v330_v49, %v334_v51  ;;  %v1364_v51 = vld [vmem:[%s2084_s3 + $0x4] sm:$0xf] }
  0x96   :  { %1359 = vmatprep.subr.msk.bf16.mxu0 %vm157_vm3, %v338_v53  ;;  %1361 = vmatprep.subr.msk.bf16.mxu1 %vm157_vm3, %v340_v52  ;;  %v357_v56 = vsel %vm157_vm3, %v339_v54, 0  ;;  %v1370_v52 = vld [vmem:[%s2085_s5 + $0x4] sm:$0xf] }
  0x97   :  { %363 = vmatpush1.bf16.msra.mxu0 %v351_v55  ;;  %404 = vmatpush1.bf16.msra.mxu1 %v357_v56 }
  0x9a   :  { %1360 = vmatmul.mubr.msk.bf16.vlgmr.msra.gmra.mrb[4].mxu0 %vm153_vm4, %v336_v57  ;;  %1362 = vmatmul.mubr.msk.bf16.vlgmr.msra.gmra.mrb[4].mxu1 %vm153_vm4, %v336_v57 }
  0x9b   :  { %556 = vmatprep.mubr.bf16.mxu0 %v1437_v4  ;;  %597 = vmatprep.mubr.bf16.mxu1 %v1437_v4 }
  0xa1   :  { %v151_v41 = vpop.permute.xlu0 %150  ;;  %v345_v30 = vpop.permute.xlu1 %344 }
 0x15d   :  { %v204_v58 = vpop.f32.mrb[0].mxu0  ;;  %v245_v59 = vpop.f32.mrb[0].mxu1 }
 0x15e   :  { %v206_v60 = vpop.f32.mrb[1].mxu0  ;;  %v247_v61 = vpop.f32.mrb[1].mxu1  ;;  %v205_v62 = vadd.f32 %v204_v58, %v151_v41  ;;  %v246_v21 = vadd.f32 %v245_v59, %v151_v41 }
 0x15f   :  { %v207_v63 = vadd.f32 %v206_v60, %v151_v41  ;;  %v208_v5 = vpop.f32.mrb[2].mxu0  ;;  %v249_v6 = vpop.f32.mrb[2].mxu1  ;;  %v248_v27 = vadd.f32 %v247_v61, %v151_v41 }
 0x160   :  { %v209_v7 = vpop.f32.mrb[3].mxu0  ;;  %v250_v10 = vpop.f32.mrb[3].mxu1  ;;  %v1716_v19 = vmax.f32 %v205_v62, 0.0  ;;  %v1724_v28 = vmax.f32 %v246_v21, 0.0 }
 0x161   :  { %v1718_v26 = vmax.f32 %v207_v63, 0.0  ;;  %v1726_v29 = vmax.f32 %v248_v27, 0.0 }
 0x162   :  { %448 = vrot.lane.b32.xlu1 %v1716_v19, %s1435_s13  ;;  %v484_v5 = vrot.slane %v1716_v19, 4  ;;  %v486_v10 = vrot.slane %v1724_v28, 4 }
 0x163   :  { %450 = vrot.lane.b32.xlu0 %v1718_v26, %s1435_s13 }
 0x166   :  { %452 = vrot.lane.b32.xlu1 %v1724_v28, %s1435_s13 }
 0x167   :  { %454 = vrot.lane.b32.xlu0 %v1726_v29, %s1435_s13 }
 0x16a   :  { %464 = vrot.lane.b32.xlu1 %v1716_v19, %s1436_s14 }
 0x16b   :  { %466 = vrot.lane.b32.xlu0 %v1718_v26, %s1436_s14 }
 0x16d   :  { %v396_v31 = vpop.f32.mrb[4].mxu0  ;;  %v437_v39 = vpop.f32.mrb[4].mxu1 }
 0x16e   :  { %v397_v40 = vadd.f32 %v396_v31, %v345_v30  ;;  %v398_v42 = vpop.f32.mrb[5].mxu0  ;;  %v439_v43 = vpop.f32.mrb[5].mxu1  ;;  %468 = vrot.lane.b32.xlu1 %v1724_v28, %s1436_s14  ;;  %v438_v17 = vadd.f32 %v437_v39, %v345_v30  ;;  %v485_v31 = vrot.slane %v1718_v26, 4  ;;  %v487_v39 = vrot.slane %v1726_v29, 4 }
 0x16f   :  { %v399_v44 = vadd.f32 %v398_v42, %v345_v30  ;;  %v400_v45 = vpop.f32.mrb[6].mxu0  ;;  %470 = vrot.lane.b32.xlu0 %v1726_v29, %s1436_s14  ;;  %v441_v15 = vpop.f32.mrb[6].mxu1  ;;  %v440_v49 = vadd.f32 %v439_v43, %v345_v30 }
 0x170   :  { %v1740_v16 = vmax.f32 %v397_v40, 0.0  ;;  %v401_v46 = vpop.f32.mrb[7].mxu0  ;;  %v442_v47 = vpop.f32.mrb[7].mxu1  ;;  %v1748_v50 = vmax.f32 %v438_v17, 0.0 }
 0x171   :  { %v1742_v48 = vmax.f32 %v399_v44, 0.0  ;;  %v1750_v33 = vmax.f32 %v440_v49, 0.0 }
 0x172   :  { %610 = vrot.lane.b32.xlu1 %v1740_v16, %s1438_s15 }
 0x173   :  { %612 = vrot.lane.b32.xlu0 %v1742_v48, %s1438_s15 }
 0x176   :  { %614 = vrot.lane.b32.xlu1 %v1748_v50, %s1438_s15 }
 0x177   :  { %616 = vrot.lane.b32.xlu0 %v1750_v33, %s1438_s15 }
 0x17a   :  { %626 = vrot.lane.b32.xlu1 %v1740_v16, %s1439_s16 }
 0x17b   :  { %628 = vrot.lane.b32.xlu0 %v1742_v48, %s1439_s16 }
 0x17e   :  { %630 = vrot.lane.b32.xlu1 %v1748_v50, %s1439_s16 }
 0x17f   :  { %632 = vrot.lane.b32.xlu0 %v1750_v33, %s1439_s16 }
 0x182   :  { %506 = vperm.xlu1 %1406, %v1364_v51  }
 0x183   :  { %668 = vperm.xlu0 %1405, %v1370_v52  }
 0x1d4   :  { %v449_v53 = vpop.permute.xlu1 %448 }
 0x1d5   :  { %v451_v54 = vpop.permute.xlu0 %450 }
 0x1d6   :  { %v458_v41 = vsel %vm61_vm0, %v449_v53, %v451_v54 }
 0x1d7   :  { %v461_v6 = vmul.f32 %v458_v41, %v1580_v24 }
 0x1d8   :  { %v453_v55 = vpop.permute.xlu1 %452 }
 0x1d9   :  { %v455_v56 = vpop.permute.xlu0 %454  ;;  %v457_v59 = vsel %vm61_vm0, %v451_v54, %v453_v55  ;;  %v493_v15 = vsel %vm137_vm2, %v461_v6, %v485_v31 }
 0x1da   :  { %v459_v57 = vsel %vm61_vm0, %v455_v56, %v449_v53  ;;  %v456_v60 = vsel %vm61_vm0, %v453_v55, %v455_v56  ;;  %v462_v21 = vmul.f32 %v457_v59, %v1583_v25  ;;  %v1363_v56 = vld [vmem:[%s2087_s2 + $0x2] sm:$0x3] }
 0x1db   :  { %v460_v61 = vmul.f32 %v459_v57, %v1568_v20  ;;  %v463_v27 = vmul.f32 %v456_v60, %v1577_v23 }
 0x1dc   :  { %v465_v58 = vpop.permute.xlu1 %464  ;;  %v494_v46 = vsel %vm137_vm2, %v462_v21, %v486_v10 }
 0x1dd   :  { %v467_v62 = vpop.permute.xlu0 %466  ;;  %v492_v40 = vsel %vm137_vm2, %v460_v61, %v484_v5  ;;  %v495_v47 = vsel %vm137_vm2, %v463_v27, %v487_v39  ;;  %v648_v27 = vrot.slane %v1748_v50, 4 }
 0x1de   :  { %v474_v63 = vsel %vm99_vm1, %v465_v58, %v467_v62 }
 0x1df   :  { %v476_v7 = vmul.f32 %v474_v63, %v1574_v22 }
 0x1e0   :  { %v469_v30 = vpop.permute.xlu1 %468 }
 0x1e1   :  { %v473_v19 = vsel %vm99_vm1, %v467_v62, %v469_v30  ;;  %v471_v42 = vpop.permute.xlu0 %470  ;;  %v498_v43 = vpack.c.bf16 %v476_v7, %v492_v40  ;;  %v646_v7 = vrot.slane %v1740_v16, 4  ;;  %v647_v40 = vrot.slane %v1742_v48, 4 }
 0x1e2   :  { %v477_v44 = vmul.f32 %v473_v19, %v1600_v36  ;;  %v472_v28 = vsel %vm99_vm1, %v469_v30, %v471_v42  ;;  %v475_v45 = vsel %vm99_vm1, %v471_v42, %v465_v58  ;;  %v649_v19 = vrot.slane %v1750_v33, 4 }
 0x1e3   :  { %v478_v26 = vmul.f32 %v472_v28, %v1603_v37  ;;  %v479_v29 = vmul.f32 %v475_v45, %v1597_v35  ;;  %v513_v54 = vsel %vm157_vm3, %v498_v43, 0 }
 0x1e4   :  { %v499_v17 = vpack.c.bf16 %v477_v44, %v493_v15  ;;  %v611_v49 = vpop.permute.xlu1 %610 }
 0x1e5   :  { %v500_v51 = vpack.c.bf16 %v478_v26, %v494_v46  ;;  %v501_v52 = vpack.c.bf16 %v479_v29, %v495_v47  ;;  %v613_v53 = vpop.permute.xlu0 %612 }
 0x1e6   :  { %1365 = vmatprep.subr.msk.bf16.mxu0 %vm157_vm3, %v499_v17  ;;  %v620_v59 = vsel %vm264_vm5, %v611_v49, %v613_v53 }
 0x1e7   :  { %525 = vmatpush1.bf16.msra.mxu0 %v513_v54  ;;  %1367 = vmatprep.subr.msk.bf16.mxu1 %vm157_vm3, %v501_v52  ;;  %v519_v55 = vsel %vm157_vm3, %v500_v51, 0  ;;  %v623_v10 = vmul.f32 %v620_v59, %v1654_v13  ;;  %v1369_v52 = vld [vmem:[%s2088_s4 + $0x2] sm:$0x3] }
 0x1e8   :  { %566 = vmatpush1.bf16.msra.mxu1 %v519_v55  ;;  %v615_v57 = vpop.permute.xlu1 %614 }
 0x1e9   :  { %v617_v41 = vpop.permute.xlu0 %616  ;;  %v619_v61 = vsel %vm264_vm5, %v613_v53, %v615_v57  ;;  %v655_v15 = vsel %vm137_vm2, %v623_v10, %v647_v40 }
 0x1ea   :  { %v621_v58 = vsel %vm264_vm5, %v617_v41, %v611_v49  ;;  %1366 = vmatmul.mubr.msk.bf16.vlgmr.msra.gmra.mrb[8].mxu0 %vm153_vm4, %v1363_v56  ;;  %v618_v62 = vsel %vm264_vm5, %v615_v57, %v617_v41  ;;  %v624_v30 = vmul.f32 %v619_v61, %v1657_v14 }
 0x1eb   :  { %1368 = vmatmul.mubr.msk.bf16.vlgmr.msra.gmra.mrb[8].mxu1 %vm153_vm4, %v1363_v56  ;;  %718 = vmatprep.mubr.bf16.mxu0 %v1437_v4  ;;  %v622_v63 = vmul.f32 %v621_v58, %v1643_v8  ;;  %v625_v31 = vmul.f32 %v618_v62, %v1660_v18 }
 0x1ec   :  { %v627_v60 = vpop.permute.xlu1 %626  ;;  %759 = vmatprep.mubr.bf16.mxu1 %v1437_v4  ;;  %v656_v29 = vsel %vm137_vm2, %v624_v30, %v648_v27 }
 0x1ed   :  { %v629_v5 = vpop.permute.xlu0 %628  ;;  %v654_v42 = vsel %vm137_vm2, %v622_v63, %v646_v7  ;;  %v657_v17 = vsel %vm137_vm2, %v625_v31, %v649_v19 }
 0x1ee   :  { %v636_v6 = vsel %vm302_vm6, %v627_v60, %v629_v5 }
 0x1ef   :  { %v638_v21 = vmul.f32 %v636_v6, %v1651_v11 }
 0x1f0   :  { %v631_v39 = vpop.permute.xlu1 %630 }
 0x1f1   :  { %v635_v16 = vsel %vm302_vm6, %v629_v5, %v631_v39  ;;  %v633_v43 = vpop.permute.xlu0 %632  ;;  %v660_v44 = vpack.c.bf16 %v638_v21, %v654_v42 }
 0x1f2   :  { %v639_v28 = vmul.f32 %v635_v16, %v1678_v34  ;;  %v634_v50 = vsel %vm302_vm6, %v631_v39, %v633_v43  ;;  %v637_v45 = vsel %vm302_vm6, %v633_v43, %v627_v60 }
 0x1f3   :  { %v640_v48 = vmul.f32 %v634_v50, %v1681_v38  ;;  %v641_v33 = vmul.f32 %v637_v45, %v1675_v32  ;;  %v675_v49 = vsel %vm157_vm3, %v660_v44, 0 }
 0x1f4   :  { %v661_v26 = vpack.c.bf16 %v639_v28, %v655_v15 }
 0x1f5   :  { %v662_v46 = vpack.c.bf16 %v640_v48, %v656_v29  ;;  %v663_v47 = vpack.c.bf16 %v641_v33, %v657_v17  ;;  %v1382_v29 = vld [vmem:[%s2085_s5 + $0x8] sm:$0xf] }
 0x1f6   :  { %1371 = vmatprep.subr.msk.bf16.mxu0 %vm157_vm3, %v661_v26  ;;  %v1376_v17 = vld [vmem:[%s2084_s3 + $0x8] sm:$0xf] }
 0x1f7   :  { %687 = vmatpush1.bf16.msra.mxu0 %v675_v49  ;;  %1373 = vmatprep.subr.msk.bf16.mxu1 %vm157_vm3, %v663_v47  ;;  %v681_v51 = vsel %vm157_vm3, %v662_v46, 0 }
 0x1f8   :  { %728 = vmatpush1.bf16.msra.mxu1 %v681_v51 }
 0x1fa   :  { %1372 = vmatmul.mubr.msk.bf16.vlgmr.msra.gmra.mrb[12].mxu0 %vm153_vm4, %v1369_v52 }
 0x1fb   :  { %1374 = vmatmul.mubr.msk.bf16.vlgmr.msra.gmra.mrb[12].mxu1 %vm153_vm4, %v1369_v52  ;;  %880 = vmatprep.mubr.bf16.mxu0 %v1437_v4 }
 0x1fc   :  { %921 = vmatprep.mubr.bf16.mxu1 %v1437_v4 }
 0x201   :  { %v507_v53 = vpop.permute.xlu1 %506 }
 0x202   :  { %v669_v27 = vpop.permute.xlu0 %668 }
 0x2bd   :  { %v558_v54 = vpop.f32.mrb[8].mxu0 }
 0x2be   :  { %v559_v55 = vadd.f32 %v558_v54, %v507_v53  ;;  %v560_v56 = vpop.f32.mrb[9].mxu0  ;;  %v599_v57 = vpop.f32.mrb[8].mxu1 }
 0x2bf   :  { %v561_v41 = vadd.f32 %v560_v56, %v507_v53  ;;  %v562_v58 = vpop.f32.mrb[10].mxu0  ;;  %v601_v59 = vpop.f32.mrb[9].mxu1  ;;  %v600_v61 = vadd.f32 %v599_v57, %v507_v53 }
 0x2c0   :  { %v1856_v60 = vmax.f32 %v559_v55, 0.0  ;;  %v563_v62 = vpop.f32.mrb[11].mxu0  ;;  %v603_v63 = vpop.f32.mrb[10].mxu1  ;;  %v602_v6 = vadd.f32 %v601_v59, %v507_v53 }
 0x2c1   :  { %v1858_v5 = vmax.f32 %v561_v41, 0.0  ;;  %v604_v7 = vpop.f32.mrb[11].mxu1  ;;  %v1864_v10 = vmax.f32 %v600_v61, 0.0 }
 0x2c2   :  { %772 = vrot.lane.b32.xlu1 %v1856_v60, %s1435_s13  ;;  %v1866_v21 = vmax.f32 %v602_v6, 0.0  ;;  %v808_v59 = vrot.slane %v1856_v60, 4 }
 0x2c3   :  { %774 = vrot.lane.b32.xlu0 %v1858_v5, %s1435_s13  ;;  %v809_v63 = vrot.slane %v1858_v5, 4 }
 0x2c6   :  { %776 = vrot.lane.b32.xlu1 %v1864_v10, %s1435_s13 }
 0x2c7   :  { %778 = vrot.lane.b32.xlu0 %v1866_v21, %s1435_s13 }
 0x2ca   :  { %788 = vrot.lane.b32.xlu1 %v1856_v60, %s1436_s14 }
 0x2cb   :  { %790 = vrot.lane.b32.xlu0 %v1858_v5, %s1436_s14 }
 0x2cd   :  { %v720_v30 = vpop.f32.mrb[12].mxu0 }
 0x2ce   :  { %v721_v31 = vadd.f32 %v720_v30, %v669_v27  ;;  %v722_v39 = vpop.f32.mrb[13].mxu0  ;;  %v761_v40 = vpop.f32.mrb[12].mxu1  ;;  %792 = vrot.lane.b32.xlu1 %v1864_v10, %s1436_s14  ;;  %v810_v30 = vrot.slane %v1864_v10, 4 }
 0x2cf   :  { %v723_v19 = vadd.f32 %v722_v39, %v669_v27  ;;  %v724_v42 = vpop.f32.mrb[14].mxu0  ;;  %v763_v16 = vpop.f32.mrb[13].mxu1  ;;  %794 = vrot.lane.b32.xlu0 %v1866_v21, %s1436_s14  ;;  %v762_v44 = vadd.f32 %v761_v40, %v669_v27 }
 0x2d0   :  { %v1880_v43 = vmax.f32 %v721_v31, 0.0  ;;  %v725_v28 = vpop.f32.mrb[15].mxu0  ;;  %v765_v50 = vpop.f32.mrb[14].mxu1  ;;  %v764_v15 = vadd.f32 %v763_v16, %v669_v27 }
 0x2d1   :  { %v1882_v45 = vmax.f32 %v723_v19, 0.0  ;;  %v766_v48 = vpop.f32.mrb[15].mxu1  ;;  %v1888_v33 = vmax.f32 %v762_v44, 0.0 }
 0x2d2   :  { %934 = vrot.lane.b32.xlu1 %v1880_v43, %s1438_s15  ;;  %v1890_v26 = vmax.f32 %v764_v15, 0.0 }
 0x2d3   :  { %936 = vrot.lane.b32.xlu0 %v1882_v45, %s1438_s15 }
 0x2d6   :  { %938 = vrot.lane.b32.xlu1 %v1888_v33, %s1438_s15 }
 0x2d7   :  { %940 = vrot.lane.b32.xlu0 %v1890_v26, %s1438_s15 }
 0x2da   :  { %950 = vrot.lane.b32.xlu1 %v1880_v43, %s1439_s16 }
 0x2db   :  { %952 = vrot.lane.b32.xlu0 %v1882_v45, %s1439_s16 }
 0x2de   :  { %954 = vrot.lane.b32.xlu1 %v1888_v33, %s1439_s16 }
 0x2df   :  { %956 = vrot.lane.b32.xlu0 %v1890_v26, %s1439_s16 }
 0x2e2   :  { %992 = vperm.xlu1 %1406, %v1382_v29  }
 0x2e3   :  { %830 = vperm.xlu0 %1405, %v1376_v17  }
 0x334   :  { %v773_v46 = vpop.permute.xlu1 %772 }
 0x335   :  { %v775_v47 = vpop.permute.xlu0 %774 }
 0x336   :  { %v782_v53 = vsel %vm61_vm0, %v773_v46, %v775_v47 }
 0x337   :  { %v785_v61 = vmul.f32 %v782_v53, %v1580_v24 }
 0x338   :  { %v777_v49 = vpop.permute.xlu1 %776 }
 0x339   :  { %v779_v51 = vpop.permute.xlu0 %778  ;;  %v781_v55 = vsel %vm61_vm0, %v775_v47, %v777_v49 }
 0x33a   :  { %v783_v52 = vsel %vm61_vm0, %v779_v51, %v773_v46  ;;  %v780_v56 = vsel %vm61_vm0, %v777_v49, %v779_v51  ;;  %v786_v6 = vmul.f32 %v781_v55, %v1583_v25  ;;  %v817_v25 = vsel %vm137_vm2, %v785_v61, %v809_v63 }
 0x33b   :  { %v784_v57 = vmul.f32 %v783_v52, %v1568_v20  ;;  %v787_v7 = vmul.f32 %v780_v56, %v1577_v23  ;;  %v811_v20 = vrot.slane %v1866_v21, 4 }
 0x33c   :  { %v789_v54 = vpop.permute.xlu1 %788  ;;  %v818_v19 = vsel %vm137_vm2, %v786_v6, %v810_v30 }
 0x33d   :  { %v791_v41 = vpop.permute.xlu0 %790  ;;  %v816_v31 = vsel %vm137_vm2, %v784_v57, %v808_v59  ;;  %v819_v42 = vsel %vm137_vm2, %v787_v7, %v811_v20  ;;  %v972_v59 = vrot.slane %v1888_v33, 4 }
 0x33e   :  { %v798_v58 = vsel %vm99_vm1, %v789_v54, %v791_v41 }
 0x33f   :  { %v800_v62 = vmul.f32 %v798_v58, %v1574_v22 }
 0x340   :  { %v793_v27 = vpop.permute.xlu1 %792 }
 0x341   :  { %v797_v60 = vsel %vm99_vm1, %v791_v41, %v793_v27  ;;  %v795_v39 = vpop.permute.xlu0 %794  ;;  %v822_v24 = vpack.c.bf16 %v800_v62, %v816_v31 }
 0x342   :  { %v801_v22 = vmul.f32 %v797_v60, %v1600_v36  ;;  %v796_v5 = vsel %vm99_vm1, %v793_v27, %v795_v39  ;;  %v799_v23 = vsel %vm99_vm1, %v795_v39, %v789_v54  ;;  %v970_v54 = vrot.slane %v1880_v43, 4 }
 0x343   :  { %v802_v10 = vmul.f32 %v796_v5, %v1603_v37  ;;  %v803_v21 = vmul.f32 %v799_v23, %v1597_v35  ;;  %v837_v50 = vsel %vm157_vm3, %v822_v24, 0  ;;  %v1375_v35 = vld [vmem:[%s2087_s2 + $0x4] sm:$0x3] }
 0x344   :  { %v823_v40 = vpack.c.bf16 %v801_v22, %v817_v25  ;;  %v935_v16 = vpop.permute.xlu1 %934 }
 0x345   :  { %v824_v44 = vpack.c.bf16 %v802_v10, %v818_v19  ;;  %v825_v36 = vpack.c.bf16 %v803_v21, %v819_v42  ;;  %v937_v28 = vpop.permute.xlu0 %936 }
 0x346   :  { %1377 = vmatprep.subr.msk.bf16.mxu0 %vm157_vm3, %v823_v40  ;;  %v944_v17 = vsel %vm264_vm5, %v935_v16, %v937_v28 }
 0x347   :  { %849 = vmatpush1.bf16.msra.mxu0 %v837_v50  ;;  %1379 = vmatprep.subr.msk.bf16.mxu1 %vm157_vm3, %v825_v36  ;;  %v843_v37 = vsel %vm157_vm3, %v824_v44, 0  ;;  %v947_v55 = vmul.f32 %v944_v17, %v1654_v13 }
 0x348   :  { %890 = vmatpush1.bf16.msra.mxu1 %v843_v37  ;;  %v939_v15 = vpop.permute.xlu1 %938 }
 0x349   :  { %v941_v48 = vpop.permute.xlu0 %940  ;;  %v943_v47 = vsel %vm264_vm5, %v937_v28, %v939_v15 }
 0x34a   :  { %v945_v29 = vsel %vm264_vm5, %v941_v48, %v935_v16  ;;  %1378 = vmatmul.mubr.msk.bf16.vlgmr.msra.gmra.mrb[16].mxu0 %vm153_vm4, %v1375_v35  ;;  %v942_v49 = vsel %vm264_vm5, %v939_v15, %v941_v48  ;;  %v948_v57 = vmul.f32 %v943_v47, %v1657_v14 }
 0x34b   :  { %1380 = vmatmul.mubr.msk.bf16.vlgmr.msra.gmra.mrb[16].mxu1 %vm153_vm4, %v1375_v35  ;;  %1042 = vmatprep.mubr.bf16.mxu0 %v1437_v4  ;;  %v946_v51 = vmul.f32 %v945_v29, %v1643_v8  ;;  %v949_v41 = vmul.f32 %v942_v49, %v1660_v18  ;;  %v973_v8 = vrot.slane %v1890_v26, 4 }
 0x34c   :  { %v951_v46 = vpop.permute.xlu1 %950  ;;  %1083 = vmatprep.mubr.bf16.mxu1 %v1437_v4  ;;  %v971_v4 = vrot.slane %v1882_v45, 4  ;;  %v980_v6 = vsel %vm137_vm2, %v948_v57, %v972_v59 }
 0x34d   :  { %v953_v52 = vpop.permute.xlu0 %952  ;;  %v978_v61 = vsel %vm137_vm2, %v946_v51, %v970_v54  ;;  %v981_v7 = vsel %vm137_vm2, %v949_v41, %v973_v8 }
 0x34e   :  { %v960_v53 = vsel %vm302_vm6, %v951_v46, %v953_v52  ;;  %v979_v18 = vsel %vm137_vm2, %v947_v55, %v971_v4 }
 0x34f   :  { %v962_v56 = vmul.f32 %v960_v53, %v1651_v11 }
 0x350   :  { %v955_v58 = vpop.permute.xlu1 %954 }
 0x351   :  { %v959_v43 = vsel %vm302_vm6, %v953_v52, %v955_v58  ;;  %v957_v62 = vpop.permute.xlu0 %956  ;;  %v984_v13 = vpack.c.bf16 %v962_v56, %v978_v61 }
 0x352   :  { %v963_v11 = vmul.f32 %v959_v43, %v1678_v34  ;;  %v958_v45 = vsel %vm302_vm6, %v955_v58, %v957_v62  ;;  %v961_v14 = vsel %vm302_vm6, %v957_v62, %v951_v46 }
 0x353   :  { %v964_v33 = vmul.f32 %v958_v45, %v1681_v38  ;;  %v965_v26 = vmul.f32 %v961_v14, %v1675_v32  ;;  %v999_v34 = vsel %vm157_vm3, %v984_v13, 0  ;;  %v1381_v32 = vld [vmem:[%s2088_s4 + $0x4] sm:$0x3] }
 0x354   :  { %v985_v63 = vpack.c.bf16 %v963_v11, %v979_v18 }
 0x355   :  { %v986_v27 = vpack.c.bf16 %v964_v33, %v980_v6  ;;  %v987_v30 = vpack.c.bf16 %v965_v26, %v981_v7  ;;  %v14_v6 = vstv %s2089_s8 }
 0x356   :  { %1383 = vmatprep.subr.msk.bf16.mxu0 %vm157_vm3, %v985_v63  ;;  %15 = vst [vmem:[#allocation2] sm:$0x1] %v14_v6 }
 0x357   :  { %1011 = vmatpush1.bf16.msra.mxu0 %v999_v34  ;;  %1385 = vmatprep.subr.msk.bf16.mxu1 %vm157_vm3, %v987_v30  ;;  %v1005_v9 = vsel %vm157_vm3, %v986_v27, 0 }
 0x358   :  { %1052 = vmatpush1.bf16.msra.mxu1 %v1005_v9 }
 0x35a   :  { %1384 = vmatmul.mubr.msk.bf16.vlgmr.msra.gmra.mrb[20].mxu0 %vm153_vm4, %v1381_v32 }
 0x35b   :  { %1386 = vmatmul.mubr.msk.bf16.vlgmr.msra.gmra.mrb[20].mxu1 %vm153_vm4, %v1381_v32 }
 0x361   :  { %v993_v19 = vpop.permute.xlu1 %992 }
 0x362   :  { %v831_v23 = vpop.permute.xlu0 %830 }
 0x41d   :  { %v882_v38 = vpop.f32.mrb[16].mxu0 }
 0x41e   :  { %v884_v20 = vpop.f32.mrb[17].mxu0  ;;  %v923_v31 = vpop.f32.mrb[16].mxu1  ;;  %v883_v21 = vadd.f32 %v882_v38, %v831_v23 }
 0x41f   :  { %v925_v60 = vpop.f32.mrb[17].mxu1  ;;  %v886_v39 = vpop.f32.mrb[18].mxu0  ;;  %v924_v25 = vadd.f32 %v923_v31, %v831_v23  ;;  %v885_v40 = vadd.f32 %v884_v20, %v831_v23 }
 0x420   :  { %v927_v24 = vpop.f32.mrb[18].mxu1  ;;  %v887_v22 = vpop.f32.mrb[19].mxu0  ;;  %v926_v10 = vadd.f32 %v925_v60, %v831_v23  ;;  %v930_v29 = vmax.f32 %v883_v21, 0.0  ;;  %v1394_v39 = vld [vmem:[%s2090_s6 + $0x1] ss:$0 sm:$0xff] }
 0x421   :  { %v928_v5 = vpop.f32.mrb[19].mxu1  ;;  %v932_v28 = vmax.f32 %v924_v25, 0.0  ;;  %v931_v17 = vmax.f32 %v885_v40, 0.0  ;;  %v1395_v24 = vld [vmem:[%s2090_s6 + $0x2] ss:$0 sm:$0xff] }
 0x422   :  { %v933_v50 = vmax.f32 %v926_v10, 0.0  ;;  %v2010_v59 = vadd.f32 %v930_v29, %v1498_v1  ;;  %v1393_v23 = vld [vmem:[%s2090_s6] ss:$0 sm:$0xff] }
 0x423   :  { %v1998_v4 = vadd.f32 %v1493_v0, %v932_v28  ;;  %v2013_v8 = vadd.f32 %v931_v17, %v1510_v3 }
 0x424   :  { %v2001_v57 = vadd.f32 %v933_v50, %v1506_v2  ;;  %v1104_v18 = vsel %vm137_vm2, %v2010_v59, 0.0 }
 0x425   :  { %v1226_v45 = vsel %vm137_vm2, %v1998_v4, 0.0  ;;  %v1105_v33 = vsel %vm137_vm2, %v2013_v8, 0.0 }
 0x426   :  { %v1227_v14 = vsel %vm137_vm2, %v2001_v57, 0.0  ;;  %v1106_v63 = vadd.f32 %v1105_v33, %v1104_v18 }
 0x427   :  { %v1228_v26 = vadd.f32 %v1227_v14, %v1226_v45 }
 0x42d   :  { %v1044_v42 = vpop.f32.mrb[20].mxu0 }
 0x42e   :  { %v1045_v16 = vadd.f32 %v1044_v42, %v993_v19  ;;  %v1046_v44 = vpop.f32.mrb[21].mxu0  ;;  %v1085_v36 = vpop.f32.mrb[20].mxu1 }
 0x42f   :  { %v1047_v37 = vadd.f32 %v1046_v44, %v993_v19  ;;  %v1086_v35 = vadd.f32 %v1085_v36, %v993_v19  ;;  %v1087_v15 = vpop.f32.mrb[21].mxu1  ;;  %v1048_v48 = vpop.f32.mrb[22].mxu0 }
 0x430   :  { %v1092_v46 = vmax.f32 %v1045_v16, 0.0  ;;  %v1088_v47 = vadd.f32 %v1087_v15, %v993_v19  ;;  %v1089_v49 = vpop.f32.mrb[22].mxu1  ;;  %v1049_v51 = vpop.f32.mrb[23].mxu0 }
 0x431   :  { %v1093_v52 = vmax.f32 %v1047_v37, 0.0  ;;  %v1094_v53 = vmax.f32 %v1086_v35, 0.0  ;;  %v1090_v54 = vpop.f32.mrb[23].mxu1 }
 0x432   :  { %v1995_v55 = vadd.f32 %v1092_v46, %v1498_v1  ;;  %v1095_v56 = vmax.f32 %v1088_v47, 0.0 }
 0x433   :  { %v2004_v41 = vadd.f32 %v1093_v52, %v1510_v3  ;;  %v2007_v58 = vadd.f32 %v1493_v0, %v1094_v53 }
 0x434   :  { %v2016_v61 = vadd.f32 %v1095_v56, %v1506_v2  ;;  %v1109_v43 = vsel %vm137_vm2, %v1995_v55, 0.0 }
 0x435   :  { %v1110_v62 = vsel %vm137_vm2, %v2004_v41, 0.0  ;;  %v1231_v13 = vsel %vm137_vm2, %v2007_v58, 0.0 }
 0x436   :  { %v1111_v0 = vadd.f32 %v1110_v62, %v1109_v43  ;;  %v1232_v1 = vsel %vm137_vm2, %v2016_v61, 0.0 }
 0x437   :  { %v1233_v11 = vadd.f32 %v1232_v1, %v1231_v13 }
 0x438   :  { %1112 = vadd.xlane.f32.xlu1 %v1111_v0 }
 0x439   :  { %1234 = vadd.xlane.f32.xlu0 %v1233_v11 }
 0x43c   :  { %1229 = vadd.xlane.f32.xlu1 %v1228_v26 }
 0x43d   :  { %1107 = vadd.xlane.f32.xlu0 %v1106_v63  ;;  %v1286_v63 = vld [vmem:[%s2091_s7] sm:$0xff] }
 0x4c5   :  { %v1113_v7 = vpop.xlane.xlu1 %1112 }
 0x4c6   :  { %v1235_v27 = vpop.xlane.xlu0 %1234  ;;  %v1115_v34 = vrot.slane %v1113_v7, 4 }
 0x4c7   :  { %v1237_v30 = vrot.slane %v1235_v27, 4 }
 0x4c9   :  { %v1230_v9 = vpop.xlane.xlu1 %1229 }
 0x4ca   :  { %v1239_v32 = vsel %vm137_vm2, %v1230_v9, %v1237_v30  ;;  %v1108_v38 = vpop.xlane.xlu0 %1107  ;;  %v1315_v9 = vld [vmem:[#allocation2] sm:$0x1] }
 0x4cb   :  { %v1240_v20 = vmul.f32 0.00390625, %v1239_v32  ;;  %v1117_v31 = vsel %vm137_vm2, %v1108_v38, %v1115_v34  ;;  %v1195_v34 = vld [vmem:[#allocation2] sm:$0x1] }
 0x4cc   :  { %v1118_v60 = vmul.f32 0.00390625, %v1117_v31 }
 0x4cd   :  { %v1242_v22 = vrot.slane %v1240_v20, 7 }
 0x4ce   :  { %v1120_v5 = vrot.slane %v1118_v60, 7 }
 0x4cf   :  { %v1244_v25 = vsel %vm1122_vm7, 0.0, %v1242_v22  ;;  %v1245_v10 = vsel %vm1122_vm7, %v1242_v22, 0.0 }
 0x4d0   :  { %v1257_v21 = vmul.f32 %v1394_v39, %v1244_v25  ;;  %v1258_v40 = vmul.f32 %v1394_v39, %v1245_v10  ;;  %v1271_v19 = vmul.f32 %v1395_v24, %v1244_v25  ;;  %v1272_v42 = vmul.f32 %v1395_v24, %v1245_v10 }
 0x4d1   :  { %v1123_v16 = vsel %vm1122_vm7, 0.0, %v1120_v5  ;;  %v1124_v44 = vsel %vm1122_vm7, %v1120_v5, 0.0  ;;  %v1251_v36 = vmul.f32 %v1393_v23, %v1244_v25 }
 0x4d2   :  { %v1261_v28 = vrot.slane %v1257_v21, 1  ;;  %v1262_v50 = vrot.slane %v1258_v40, 1  ;;  %v1275_v37 = vrot.slane %v1271_v19, 2  ;;  %v1276_v35 = vrot.slane %v1272_v42, 2 }
 0x4d3   :  { %v1136_v15 = vmul.f32 %v1394_v39, %v1123_v16  ;;  %v1137_v48 = vmul.f32 %v1394_v39, %v1124_v44  ;;  %v1151_v29 = vmul.f32 %v1395_v24, %v1123_v16  ;;  %v1152_v46 = vmul.f32 %v1395_v24, %v1124_v44 }
 0x4d4   :  { %v1263_v17 = vsel %vm1140_vm8, %v1261_v28, %v1262_v50  ;;  %v1277_v52 = vsel %vm157_vm3, %v1275_v37, %v1276_v35  ;;  %v1130_v53 = vmul.f32 %v1393_v23, %v1123_v16 }
 0x4d5   :  { %v1265_v47 = vadd.f32 %v1263_v17, %v1251_v36  ;;  %v1141_v49 = vrot.slane %v1136_v15, 1  ;;  %v1142_v51 = vrot.slane %v1137_v48, 1  ;;  %v1155_v54 = vrot.slane %v1151_v29, 2 }
 0x4d6   :  { %v1156_v56 = vrot.slane %v1152_v46, 2 }
 0x4d7   :  { %v1279_v43 = vadd.f32 %v1277_v52, %v1265_v47  ;;  %v1143_v62 = vsel %vm1140_vm8, %v1141_v49, %v1142_v51 }
 0x4d8   :  { %v1145_v13 = vadd.f32 %v1143_v62, %v1130_v53  ;;  %v1157_v1 = vsel %vm157_vm3, %v1155_v54, %v1156_v56 }
 0x4d9   :  { %v1396_v0 = vmul.f32 -1.442695, %v1279_v43 }
 0x4da   :  { %v1159_v11 = vadd.f32 %v1157_v1, %v1145_v13 }
 0x4db   :  { %1409 = vpow2.f32 %v1396_v0 }
 0x4dc   :  { %v1390_v45 = vmul.f32 -1.442695, %v1159_v11 }
 0x4de   :  { %1411 = vpow2.f32 %v1390_v45 }
 0x4e5   :  { %v1410_v14 = vpop.eup %1409 }
 0x4e6   :  { %v1283_v18 = vadd.f32 1.0, %v1410_v14 }
 0x4e8   :  { %v1412_v33 = vpop.eup %1411  ;;  %1413 = vrcp.f32 %v1283_v18 }
 0x4e9   :  { %v1163_v26 = vadd.f32 1.0, %v1412_v33 }
 0x4eb   :  { %1415 = vrcp.f32 %v1163_v26 }
 0x4f2   :  { %v1414_v6 = vpop.eup %1413 }
 0x4f3   :  { %v1287_v7 = vmul.f32 %v1414_v6, %v1286_v63 }
 0x4f5   :  { %v1416_v27 = vpop.eup %1415  ;;  %1290 = vperm.xlu1 %1406, %v1287_v7  }
 0x4f6   :  { %v1167_v30 = vmul.f32 %v1416_v27, %v1286_v63 }
 0x4f8   :  { %1170 = vperm.xlu0 %1405, %v1167_v30  }
 0x4f9   :  { %1198 = vperm.xlu1 %1406, %v1195_v34  }
 0x4fc   :  { %1318 = vperm.xlu0 %1405, %v1315_v9  }
 0x574   :  { %v1291_v32 = vpop.permute.xlu1 %1290 }
 0x575   :  { %v1295_v38 = vrot.slane %v1291_v32, 4  ;;  %v1293_v20 = vmul.f32 %v1291_v32, %v1998_v4  ;;  %v1294_v31 = vmul.f32 %v1291_v32, %v2001_v57 }
 0x577   :  { %v1297_v60 = vmul.f32 %v1295_v38, %v2007_v58  ;;  %v1298_v39 = vmul.f32 %v1295_v38, %v2016_v61  ;;  %v1171_v24 = vpop.permute.xlu0 %1170 }
 0x578   :  { %v1175_v22 = vrot.slane %v1171_v24, 4  ;;  %v1173_v25 = vmul.f32 %v1171_v24, %v2010_v59  ;;  %v1174_v10 = vmul.f32 %v1171_v24, %v2013_v8  ;;  %v1199_v52 = vpop.permute.xlu1 %1198 }
 0x579   :  { %v1299_v5 = vadd.f32 %v1297_v60, %v1293_v20  ;;  %v1300_v23 = vadd.f32 %v1298_v39, %v1294_v31  ;;  %v1204_v45 = vrot.slane %v1199_v52, %v1552_v12  ;;  %v1433_v60 = vld [vmem:[%s2083_s0 + $0x8] sm:$0xff] }
 0x57a   :  { %v1177_v21 = vmul.f32 %v1175_v22, %v1995_v55  ;;  %v1178_v40 = vmul.f32 %v1175_v22, %v2004_v41 }
 0x57b   :  { %v1301_v4 = vsel %vm137_vm2, %v1299_v5, 0.0  ;;  %v1308_v57 = vsel %vm137_vm2, %v1300_v23, 0.0  ;;  %v1319_v17 = vpop.permute.xlu0 %1318  ;;  %v1434_v23 = vld [vmem:[%s2083_s0] sm:$0xff] }
 0x57c   :  { %v1302_v19 = vrot.slane %v1301_v4, 4  ;;  %v1309_v58 = vrot.slane %v1308_v57, 4  ;;  %v1179_v42 = vadd.f32 %v1177_v21, %v1173_v25  ;;  %v1180_v61 = vadd.f32 %v1178_v40, %v1174_v10 }
 0x57d   :  { %v1324_v56 = vrot.slane %v1319_v17, %v1552_v12 }
 0x57e   :  { %v1181_v16 = vsel %vm137_vm2, %v1179_v42, 0.0  ;;  %v1188_v44 = vsel %vm137_vm2, %v1180_v61, 0.0  ;;  %v1303_v36 = vadd.f32 %v1302_v19, %v1301_v4  ;;  %v1310_v59 = vadd.f32 %v1309_v58, %v1308_v57 }
 0x57f   :  { %v1182_v28 = vrot.slane %v1181_v16, 4  ;;  %v1189_v8 = vrot.slane %v1188_v44, 4 }
 0x580   :  { %v1304_v50 = vrot.slane %v1303_v36, 2  ;;  %v1311_v55 = vrot.slane %v1310_v59, 2 }
 0x581   :  { %v1183_v37 = vadd.f32 %v1182_v28, %v1181_v16  ;;  %v1190_v41 = vadd.f32 %v1189_v8, %v1188_v44 }
 0x582   :  { %v1305_v35 = vadd.f32 %v1304_v50, %v1303_v36  ;;  %v1312_v15 = vadd.f32 %v1311_v55, %v1310_v59 }
 0x583   :  { %v1184_v48 = vrot.slane %v1183_v37, 2  ;;  %v1191_v29 = vrot.slane %v1190_v41, 2 }
 0x584   :  { %v1306_v46 = vrot.slane %v1305_v35, 1  ;;  %v1313_v47 = vrot.slane %v1312_v15, 1 }
 0x585   :  { %v1185_v49 = vadd.f32 %v1184_v48, %v1183_v37  ;;  %v1192_v51 = vadd.f32 %v1191_v29, %v1190_v41 }
 0x586   :  { %v1307_v53 = vadd.f32 %v1306_v46, %v1305_v35  ;;  %v1314_v54 = vadd.f32 %v1313_v47, %v1312_v15 }
 0x587   :  { %v1186_v43 = vrot.slane %v1185_v49, 1  ;;  %v1193_v62 = vrot.slane %v1192_v51, 1 }
 0x588   :  { %v1325_v13 = vadd.f32 %v1324_v56, %v1307_v53  ;;  %v1326_v0 = vadd.f32 %v1324_v56, %v1314_v54 }
 0x589   :  { %v1187_v1 = vadd.f32 %v1186_v43, %v1185_v49  ;;  %v1194_v11 = vadd.f32 %v1193_v62, %v1192_v51 }
 0x58a   :  { %v1397_v14 = vmul.f32 -1.442695, %v1325_v13  ;;  %v1398_v18 = vmul.f32 -1.442695, %v1326_v0 }
 0x58b   :  { %v1205_v33 = vadd.f32 %v1204_v45, %v1187_v1  ;;  %v1206_v26 = vadd.f32 %v1204_v45, %v1194_v11 }
 0x58c   :  { %1417 = vpow2.f32 %v1397_v14 }
 0x58d   :  { %v1391_v63 = vmul.f32 -1.442695, %v1205_v33  ;;  %v1392_v6 = vmul.f32 -1.442695, %v1206_v26  ;;  %1419 = vpow2.f32 %v1398_v18 }
 0x58f   :  { %1421 = vpow2.f32 %v1391_v63 }
 0x590   :  { %1423 = vpow2.f32 %v1392_v6 }
 0x596   :  { %v1418_v7 = vpop.eup %1417 }
 0x597   :  { %v1420_v27 = vpop.eup %1419  ;;  %v1333_v30 = vadd.f32 1.0, %v1418_v7 }
 0x598   :  { %v1334_v34 = vadd.f32 1.0, %v1420_v27 }
 0x599   :  { %v1422_v9 = vpop.eup %1421  ;;  %1425 = vrcp.f32 %v1333_v30 }
 0x59a   :  { %v1424_v32 = vpop.eup %1423  ;;  %v1213_v38 = vadd.f32 1.0, %v1422_v9  ;;  %1427 = vrcp.f32 %v1334_v34 }
 0x59b   :  { %v1214_v12 = vadd.f32 1.0, %v1424_v32 }
 0x59c   :  { %1429 = vrcp.f32 %v1213_v38 }
 0x59d   :  { %1431 = vrcp.f32 %v1214_v12 }
 0x5a3   :  { %v1426_v20 = vpop.eup %1425 }
 0x5a4   :  { %v1428_v31 = vpop.eup %1427  ;;  %v1339_v39 = vmul.f32 %v1433_v60, %v1426_v20 }
 0x5a5   :  { %v1340_v24 = vmul.f32 %v1428_v31, %v1506_v2 }
 0x5a6   :  { %v1430_v22 = vpop.eup %1429 }
 0x5a7   :  { %v1432_v5 = vpop.eup %1431  ;;  %v1219_v25 = vmul.f32 %v1434_v23, %v1430_v22  ;;  %v1343_v10 = vcombine.low %v1339_v39, %v1340_v24 }
 0x5a8   :  { %v1220_v21 = vmul.f32 %v1432_v5, %v1510_v3 }
 0x5a9   :  { %1399 = vst [vmem:[%s2092_s9 + $0x8] sm:$0xff] %v1343_v10 }
 0x5aa   :  { %v1223_v40 = vcombine.low %v1219_v25, %v1220_v21 }
 0x5ac   :  { %1225 = vst [vmem:[%s2092_s9] sm:$0xff] %v1223_v40 }

</bundles_post_ra>
